<compile_context>
chip_gen: v7x
topology: tpu7x:2x2x1
jax: 0.10.0
libtpu: 0.0.40
codegen_flags: <defaults>
</compile_context>

<pallas_src>
import functools

import jax
import jax.numpy as jnp
from jax import lax
from jax.experimental import pallas as pl
from jax.experimental.pallas import tpu as pltpu


def lstm_mlp_kernel(x_ref,
                    wih0_ref, b0_ref,
                    wbig_ref, bbig_ref,
                    fc1w_ref, fc1b_ref,
                    fc2w_ref, fc2b_ref,
                    out_ref,
                    gx0_ref,
                    *, T, Bp, H):
    """x_ref: (T*Bp, I) f32, time-major, batch padded to Bp.

    wih0 (I,4H) bf16, wbig (3H, 12H) bf16 fused block matrix, biases f32.
    Gate order everywhere is (i, f, o, g).
    """
    G = 4 * H

    # Layer-0 input projection for ALL time steps: one hoisted MXU matmul.
    gx0_ref[...] = (
        jnp.dot(x_ref[...].astype(jnp.bfloat16), wih0_ref[...],
                preferred_element_type=jnp.float32)
        + b0_ref[...])

    wbig = wbig_ref[...]          # (3H, 12H) bf16, held live across diagonals
    bbig = bbig_ref[...]          # (1, 12H) f32 ([0 | b1 | b2]; b0 is in gx0)

    def cell(gates, c):
        # gates: (Bp, 4H) f32 in (i, f, o, g) order.
        s = jax.nn.sigmoid(gates[:, :3 * H])          # one EUP region (i,f,o)
        g = jnp.tanh(gates[:, 3 * H:])                # one EUP region (g)
        c_new = s[:, H:2 * H] * c + s[:, 0:H] * g
        h_new = s[:, 2 * H:3 * H] * jnp.tanh(c_new)
        return h_new, c_new

    zero = jnp.zeros((Bp, H), jnp.float32)
    h = [zero, zero, zero]
    c = [zero, zero, zero]

    # Wavefront: diagonal d handles layer l at step t = d - l (static unroll).
    # All matmul inputs (h[0..2]) are consumed into `big` BEFORE any state
    # update inside the diagonal, so in-place h/c updates below are safe.
    for d in range(T + 2):
        h_in = jnp.concatenate(h, axis=1).astype(jnp.bfloat16)   # (Bp, 3H)
        big = (jnp.dot(h_in, wbig, preferred_element_type=jnp.float32)
               + bbig)                                            # (Bp, 12H)

        if d < T:                       # layer 0, step t = d
            g0 = big[:, 0:G] + gx0_ref[pl.ds(d * Bp, Bp), :]
            h[0], c[0] = cell(g0, c[0])
        if 0 <= d - 1 < T:              # layer 1, step t = d - 1
            h[1], c[1] = cell(big[:, G:2 * G], c[1])
        if 0 <= d - 2 < T:              # layer 2, step t = d - 2
            h[2], c[2] = cell(big[:, 2 * G:3 * G], c[2])

    # dropout(0.2) is identity in eval mode; fc1 -> relu -> fc2 (lane-dense).
    z = jnp.maximum(
        jnp.dot(h[2].astype(jnp.bfloat16), fc1w_ref[...],
                preferred_element_type=jnp.float32) + fc1b_ref[...], 0.0)
    out_ref[...] = (
        jnp.dot(z.astype(jnp.bfloat16), fc2w_ref[...],
                preferred_element_type=jnp.float32)
        + fc2b_ref[...]).astype(out_ref.dtype)


def _permute_gates_ifog(w, H):
    """Permute last-dim gate blocks from PyTorch (i,f,g,o) to kernel (i,f,o,g)."""
    i, f, g, o = (w[..., 0 * H:1 * H], w[..., 1 * H:2 * H],
                  w[..., 2 * H:3 * H], w[..., 3 * H:4 * H])
    return jnp.concatenate([i, f, o, g], axis=-1)


def _prepare_kernel_params(params):
    H = params["whh0"].shape[0]
    C = params["fc2_w"].shape[1]
    F1 = params["fc1_w"].shape[1]
    Cp = ((C + 127) // 128) * 128          # lane-dense output width
    F1p = ((F1 + 127) // 128) * 128        # lane-dense fc1 width
    G = 4 * H

    p = lambda w: _permute_gates_ifog(w, H)
    wih0, whh0, b0 = p(params["wih0"]), p(params["whh0"]), p(params["b0"])
    wih1, whh1, b1 = p(params["wih1"]), p(params["whh1"]), p(params["b1"])
    wih2, whh2, b2 = p(params["wih2"]), p(params["whh2"]), p(params["b2"])

    # Fused wavefront weight: rows = [h0 | h1 | h2], cols = [gates0|gates1|gates2]
    #   h0 -> whh0 (its own recurrence) and wih1 (layer-1 input projection)
    #   h1 -> whh1 and wih2
    #   h2 -> whh2
    z = jnp.zeros((H, G), jnp.float32)
    wbig = jnp.concatenate([
        jnp.concatenate([whh0, wih1, z], axis=1),
        jnp.concatenate([z, whh1, wih2], axis=1),
        jnp.concatenate([z, z, whh2], axis=1)], axis=0)            # (3H, 12H)
    bbig = jnp.concatenate([jnp.zeros((1, G), jnp.float32), b1, b2], axis=1)

    fc1_w = jnp.pad(params["fc1_w"], ((0, 0), (0, F1p - F1)))
    fc1_b = jnp.pad(params["fc1_b"], ((0, 0), (0, F1p - F1)))
    fc2_w = jnp.pad(params["fc2_w"], ((0, F1p - F1), (0, Cp - C)))  # zero rows/cols: exact
    fc2_b = jnp.pad(params["fc2_b"], ((0, 0), (0, Cp - C)))

    kp = {
        "wih0": wih0.astype(jnp.bfloat16),
        "b0": b0,
        "wbig": wbig.astype(jnp.bfloat16),
        "bbig": bbig,
        "fc1_w": fc1_w.astype(jnp.bfloat16),
        "fc1_b": fc1_b,
        "fc2_w": fc2_w.astype(jnp.bfloat16),
        "fc2_b": fc2_b,
    }
    return kp, Cp


def lstm_model_forward(x, params):
    """x: (B, T, input_size) float32, batch_first like PyTorch."""
    B, T, I = x.shape
    H = params["whh0"].shape[0]
    C = params["fc2_w"].shape[1]
    Bp = ((B + 7) // 8) * 8                # pad batch to full f32 sublane groups

    # (B, T, I) -> (T, Bp, I) -> (T*Bp, I): time-major, batch-padded, flattened
    # so every in-kernel access is a static, aligned slice (no reshapes inside).
    x_tbi = jnp.transpose(x, (1, 0, 2))
    x_pad = jnp.pad(x_tbi, ((0, 0), (0, Bp - B), (0, 0)))
    x_flat = x_pad.reshape(T * Bp, I)

    kp, Cp = _prepare_kernel_params(params)

    vmem = pl.BlockSpec(memory_space=pltpu.MemorySpace.VMEM)
    ins = [x_flat,
           kp["wih0"], kp["b0"],
           kp["wbig"], kp["bbig"],
           kp["fc1_w"], kp["fc1_b"],
           kp["fc2_w"], kp["fc2_b"]]

    out_padded = pl.pallas_call(
        functools.partial(lstm_mlp_kernel, T=T, Bp=Bp, H=H),
        out_shape=jax.ShapeDtypeStruct((Bp, Cp), jnp.float32),
        in_specs=[vmem] * len(ins),
        out_specs=vmem,
        scratch_shapes=[
            pltpu.VMEM((T * Bp, 4 * H), jnp.float32),   # hoisted layer-0 gates
        ],
    )(*ins)

    return out_padded[:B, :C]


def init_params(key, input_size, hidden_size, num_classes):
    """Deterministic synthetic init (PyTorch-style uniform(-1/sqrt(H), 1/sqrt(H))).

    Weights are stored transposed relative to PyTorch, i.e. (in, 4H), gate
    order (i, f, g, o); b = b_ih + b_hh.
    """
    H = hidden_size
    k = 1.0 / jnp.sqrt(jnp.float32(H))
    keys = jax.random.split(key, 16)
    u = lambda kk, shape: jax.random.uniform(kk, shape, jnp.float32, -k, k)

    params = {}
    in_sizes = [input_size, H, H]
    ki = 0
    for layer in range(3):
        params[f"wih{layer}"] = u(keys[ki], (in_sizes[layer], 4 * H)); ki += 1
        params[f"whh{layer}"] = u(keys[ki], (H, 4 * H)); ki += 1
        params[f"b{layer}"] = (u(keys[ki], (1, 4 * H)) + u(keys[ki + 1], (1, 4 * H)))
        ki += 2
    params["fc1_w"] = u(keys[ki], (H, 32)); ki += 1
    params["fc1_b"] = u(keys[ki], (1, 32)); ki += 1
    params["fc2_w"] = u(keys[ki], (32, num_classes)); ki += 1
    params["fc2_b"] = u(keys[ki], (1, num_classes)); ki += 1
    return params


def reference_forward(x, params):
    """Pure-JAX reference of the PyTorch forward (true f32 matmuls)."""
    B, T, I = x.shape
    H = params["whh0"].shape[0]
    hi = lax.Precision.HIGHEST

    def cell(xt, h, c, wih, whh, b):
        gates = (jnp.dot(xt, wih, precision=hi)
                 + jnp.dot(h, whh, precision=hi) + b)
        i = jax.nn.sigmoid(gates[:, 0 * H:1 * H])
        f = jax.nn.sigmoid(gates[:, 1 * H:2 * H])
        g = jnp.tanh(gates[:, 2 * H:3 * H])
        o = jax.nn.sigmoid(gates[:, 3 * H:4 * H])
        c = f * c + i * g
        h = o * jnp.tanh(c)
        return h, c

    hs = [jnp.zeros((B, H), jnp.float32) for _ in range(3)]
    cs = [jnp.zeros((B, H), jnp.float32) for _ in range(3)]
    for t in range(T):
        inp = x[:, t, :]
        for layer in range(3):
            hs[layer], cs[layer] = cell(inp, hs[layer], cs[layer],
                                        params[f"wih{layer}"],
                                        params[f"whh{layer}"],
                                        params[f"b{layer}"])
            inp = hs[layer]
    z = jnp.maximum(jnp.dot(hs[2], params["fc1_w"], precision=hi)
                    + params["fc1_b"], 0.0)
    return jnp.dot(z, params["fc2_w"], precision=hi) + params["fc2_b"]


if __name__ == "__main__":
    B, T = 4, 8
    input_size, hidden_size, num_classes = 16, 32, 3

    key = jax.random.PRNGKey(0)
    kx, kp = jax.random.split(key)
    x = jax.random.normal(kx, (B, T, input_size), jnp.float32)
    params = init_params(kp, input_size, hidden_size, num_classes)

    out = lstm_model_forward(x, params)
    out = jax.block_until_ready(out)

    ref = reference_forward(x, params)
    assert out.shape == (B, num_classes)
    # Kernel intentionally uses bf16 MXU operands (f32 accumulate); reference
    # is true f32 (Precision.HIGHEST), hence the bf16-level tolerance.
    assert jnp.allclose(out, ref, atol=2e-2, rtol=2e-2)

    print("KERNEL_OK")
</pallas_src>

<mosaic_0001>
module attributes {stable_mosaic.version = 11 : i64} {
  func.func @lstm_mlp_kernel(%arg0: memref<64x16xf32, #tpu.memory_space<vmem>>, %arg1: memref<16x128xbf16, #tpu.memory_space<vmem>>, %arg2: memref<1x128xf32, #tpu.memory_space<vmem>>, %arg3: memref<96x384xbf16, #tpu.memory_space<vmem>>, %arg4: memref<1x384xf32, #tpu.memory_space<vmem>>, %arg5: memref<32x128xbf16, #tpu.memory_space<vmem>>, %arg6: memref<1x128xf32, #tpu.memory_space<vmem>>, %arg7: memref<128x128xbf16, #tpu.memory_space<vmem>>, %arg8: memref<1x128xf32, #tpu.memory_space<vmem>>, %arg9: memref<8x128xf32, #tpu.memory_space<vmem>>, %arg10: memref<64x128xf32, #tpu.memory_space<vmem>>) attributes {dimension_semantics = [], scalar_prefetch = 0 : i64, scratch_operands = 1 : i64, tpu.core_type = #tpu.core_type<tc>} {
    %c0 = arith.constant 0 : index
    %c0_0 = arith.constant 0 : index
    %0 = vector.load %arg0[%c0, %c0_0] : memref<64x16xf32, #tpu.memory_space<vmem>>, vector<64x16xf32>
    %1 = arith.truncf %0 : vector<64x16xf32> to vector<64x16xbf16>
    %c0_1 = arith.constant 0 : index
    %c0_2 = arith.constant 0 : index
    %2 = vector.load %arg1[%c0_1, %c0_2] : memref<16x128xbf16, #tpu.memory_space<vmem>>, vector<16x128xbf16>
    %cst = arith.constant dense<0.000000e+00> : vector<64x128xf32>
    %3 = tpu.matmul %1, %2, %cst {dimension_numbers = #tpu.dot_dimension_numbers<[1], [0], [0], [1], [0, 0, 1, 1], [], []>} : vector<64x16xbf16>, vector<16x128xbf16>, vector<64x128xf32> -> vector<64x128xf32>
    %c0_3 = arith.constant 0 : index
    %c0_4 = arith.constant 0 : index
    %4 = vector.load %arg2[%c0_3, %c0_4] : memref<1x128xf32, #tpu.memory_space<vmem>>, vector<1x128xf32>
    %5 = vector.broadcast %4 : vector<1x128xf32> to vector<64x128xf32>
    %6 = arith.addf %3, %5 : vector<64x128xf32>
    %c0_5 = arith.constant 0 : index
    %c0_6 = arith.constant 0 : index
    %7 = vector.load %arg10[%c0_5, %c0_6] : memref<64x128xf32, #tpu.memory_space<vmem>>, vector<64x128xf32>
    tpu.vector_store %arg10[%c0_5, %c0_6], %6 {strides = array<i32>} : memref<64x128xf32, #tpu.memory_space<vmem>>, vector<64x128xf32>,
    %c0_7 = arith.constant 0 : index
    %c0_8 = arith.constant 0 : index
    %8 = vector.load %arg3[%c0_7, %c0_8] : memref<96x384xbf16, #tpu.memory_space<vmem>>, vector<96x384xbf16>
    %c0_9 = arith.constant 0 : index
    %c0_10 = arith.constant 0 : index
    %9 = vector.load %arg4[%c0_9, %c0_10] : memref<1x384xf32, #tpu.memory_space<vmem>>, vector<1x384xf32>
    %cst_11 = arith.constant 0.000000e+00 : f32
    %10 = vector.broadcast %cst_11 : f32 to vector<8x32xf32>
    %11 = tpu.concatenate %10, %10, %10 in 1 : vector<8x32xf32>, vector<8x32xf32>, vector<8x32xf32> -> vector<8x96xf32>
    %12 = arith.truncf %11 : vector<8x96xf32> to vector<8x96xbf16>
    %cst_12 = arith.constant dense<0.000000e+00> : vector<8x384xf32>
    %13 = tpu.matmul %12, %8, %cst_12 {dimension_numbers = #tpu.dot_dimension_numbers<[1], [0], [0], [1], [0, 0, 1, 1], [], []>} : vector<8x96xbf16>, vector<96x384xbf16>, vector<8x384xf32> -> vector<8x384xf32>
    %14 = vector.broadcast %9 : vector<1x384xf32> to vector<8x384xf32>
    %15 = arith.addf %13, %14 : vector<8x384xf32>
    %16 = vector.extract_strided_slice %15 {offsets = [0, 0], sizes = [8, 128], strides = [1, 1]} : vector<8x384xf32> to vector<8x128xf32>
    %c0_13 = arith.constant 0 : index
    %c0_14 = arith.constant 0 : index
    %17 = vector.load %arg10[%c0_13, %c0_14] : memref<64x128xf32, #tpu.memory_space<vmem>>, vector<8x128xf32>
    %18 = arith.addf %16, %17 : vector<8x128xf32>
    %19 = vector.extract_strided_slice %18 {offsets = [0, 0], sizes = [8, 96], strides = [1, 1]} : vector<8x128xf32> to vector<8x96xf32>
    %20 = arith.negf %19 : vector<8x96xf32>
    %21 = math.exp %20 : vector<8x96xf32>
    %cst_15 = arith.constant 1.000000e+00 : f32
    %22 = vector.broadcast %cst_15 : f32 to vector<8x96xf32>
    %23 = arith.addf %22, %21 : vector<8x96xf32>
    %24 = arith.divf %22, %23 : vector<8x96xf32>
    %25 = vector.extract_strided_slice %18 {offsets = [0, 96], sizes = [8, 32], strides = [1, 1]} : vector<8x128xf32> to vector<8x32xf32>
    %26 = math.tanh %25 : vector<8x32xf32>
    %27 = vector.extract_strided_slice %24 {offsets = [0, 32], sizes = [8, 32], strides = [1, 1]} : vector<8x96xf32> to vector<8x32xf32>
    %28 = arith.mulf %27, %10 : vector<8x32xf32>
    %29 = vector.extract_strided_slice %24 {offsets = [0, 0], sizes = [8, 32], strides = [1, 1]} : vector<8x96xf32> to vector<8x32xf32>
    %30 = arith.mulf %29, %26 : vector<8x32xf32>
    %31 = arith.addf %28, %30 : vector<8x32xf32>
    %32 = vector.extract_strided_slice %24 {offsets = [0, 64], sizes = [8, 32], strides = [1, 1]} : vector<8x96xf32> to vector<8x32xf32>
    %33 = math.tanh %31 : vector<8x32xf32>
    %34 = arith.mulf %32, %33 : vector<8x32xf32>
    %35 = tpu.concatenate %34, %10, %10 in 1 : vector<8x32xf32>, vector<8x32xf32>, vector<8x32xf32> -> vector<8x96xf32>
    %36 = arith.truncf %35 : vector<8x96xf32> to vector<8x96xbf16>
    %cst_16 = arith.constant dense<0.000000e+00> : vector<8x384xf32>
    %37 = tpu.matmul %36, %8, %cst_16 {dimension_numbers = #tpu.dot_dimension_numbers<[1], [0], [0], [1], [0, 0, 1, 1], [], []>} : vector<8x96xbf16>, vector<96x384xbf16>, vector<8x384xf32> -> vector<8x384xf32>
    %38 = vector.broadcast %9 : vector<1x384xf32> to vector<8x384xf32>
    %39 = arith.addf %37, %38 : vector<8x384xf32>
    %40 = vector.extract_strided_slice %39 {offsets = [0, 0], sizes = [8, 128], strides = [1, 1]} : vector<8x384xf32> to vector<8x128xf32>
    %c8 = arith.constant 8 : index
    %c0_17 = arith.constant 0 : index
    %41 = vector.load %arg10[%c8, %c0_17] : memref<64x128xf32, #tpu.memory_space<vmem>>, vector<8x128xf32>
    %42 = arith.addf %40, %41 : vector<8x128xf32>
    %43 = vector.extract_strided_slice %42 {offsets = [0, 0], sizes = [8, 96], strides = [1, 1]} : vector<8x128xf32> to vector<8x96xf32>
    %44 = arith.negf %43 : vector<8x96xf32>
    %45 = math.exp %44 : vector<8x96xf32>
    %cst_18 = arith.constant 1.000000e+00 : f32
    %46 = vector.broadcast %cst_18 : f32 to vector<8x96xf32>
    %47 = arith.addf %46, %45 : vector<8x96xf32>
    %48 = arith.divf %46, %47 : vector<8x96xf32>
    %49 = vector.extract_strided_slice %42 {offsets = [0, 96], sizes = [8, 32], strides = [1, 1]} : vector<8x128xf32> to vector<8x32xf32>
    %50 = math.tanh %49 : vector<8x32xf32>
    %51 = vector.extract_strided_slice %48 {offsets = [0, 32], sizes = [8, 32], strides = [1, 1]} : vector<8x96xf32> to vector<8x32xf32>
    %52 = arith.mulf %51, %31 : vector<8x32xf32>
    %53 = vector.extract_strided_slice %48 {offsets = [0, 0], sizes = [8, 32], strides = [1, 1]} : vector<8x96xf32> to vector<8x32xf32>
    %54 = arith.mulf %53, %50 : vector<8x32xf32>
    %55 = arith.addf %52, %54 : vector<8x32xf32>
    %56 = vector.extract_strided_slice %48 {offsets = [0, 64], sizes = [8, 32], strides = [1, 1]} : vector<8x96xf32> to vector<8x32xf32>
    %57 = math.tanh %55 : vector<8x32xf32>
    %58 = arith.mulf %56, %57 : vector<8x32xf32>
    %59 = vector.extract_strided_slice %39 {offsets = [0, 128], sizes = [8, 128], strides = [1, 1]} : vector<8x384xf32> to vector<8x128xf32>
    %60 = vector.extract_strided_slice %59 {offsets = [0, 0], sizes = [8, 96], strides = [1, 1]} : vector<8x128xf32> to vector<8x96xf32>
    %61 = arith.negf %60 : vector<8x96xf32>
    %62 = math.exp %61 : vector<8x96xf32>
    %cst_19 = arith.constant 1.000000e+00 : f32
    %63 = vector.broadcast %cst_19 : f32 to vector<8x96xf32>
    %64 = arith.addf %63, %62 : vector<8x96xf32>
    %65 = arith.divf %63, %64 : vector<8x96xf32>
    %66 = vector.extract_strided_slice %59 {offsets = [0, 96], sizes = [8, 32], strides = [1, 1]} : vector<8x128xf32> to vector<8x32xf32>
    %67 = math.tanh %66 : vector<8x32xf32>
    %68 = vector.extract_strided_slice %65 {offsets = [0, 32], sizes = [8, 32], strides = [1, 1]} : vector<8x96xf32> to vector<8x32xf32>
    %69 = arith.mulf %68, %10 : vector<8x32xf32>
    %70 = vector.extract_strided_slice %65 {offsets = [0, 0], sizes = [8, 32], strides = [1, 1]} : vector<8x96xf32> to vector<8x32xf32>
    %71 = arith.mulf %70, %67 : vector<8x32xf32>
    %72 = arith.addf %69, %71 : vector<8x32xf32>
    %73 = vector.extract_strided_slice %65 {offsets = [0, 64], sizes = [8, 32], strides = [1, 1]} : vector<8x96xf32> to vector<8x32xf32>
    %74 = math.tanh %72 : vector<8x32xf32>
    %75 = arith.mulf %73, %74 : vector<8x32xf32>
    %76 = tpu.concatenate %58, %75, %10 in 1 : vector<8x32xf32>, vector<8x32xf32>, vector<8x32xf32> -> vector<8x96xf32>
    %77 = arith.truncf %76 : vector<8x96xf32> to vector<8x96xbf16>
    %cst_20 = arith.constant dense<0.000000e+00> : vector<8x384xf32>
    %78 = tpu.matmul %77, %8, %cst_20 {dimension_numbers = #tpu.dot_dimension_numbers<[1], [0], [0], [1], [0, 0, 1, 1], [], []>} : vector<8x96xbf16>, vector<96x384xbf16>, vector<8x384xf32> -> vector<8x384xf32>
    %79 = vector.broadcast %9 : vector<1x384xf32> to vector<8x384xf32>
    %80 = arith.addf %78, %79 : vector<8x384xf32>
    %81 = vector.extract_strided_slice %80 {offsets = [0, 0], sizes = [8, 128], strides = [1, 1]} : vector<8x384xf32> to vector<8x128xf32>
    %c16 = arith.constant 16 : index
    %c0_21 = arith.constant 0 : index
    %82 = vector.load %arg10[%c16, %c0_21] : memref<64x128xf32, #tpu.memory_space<vmem>>, vector<8x128xf32>
    %83 = arith.addf %81, %82 : vector<8x128xf32>
    %84 = vector.extract_strided_slice %83 {offsets = [0, 0], sizes = [8, 96], strides = [1, 1]} : vector<8x128xf32> to vector<8x96xf32>
    %85 = arith.negf %84 : vector<8x96xf32>
    %86 = math.exp %85 : vector<8x96xf32>
    %cst_22 = arith.constant 1.000000e+00 : f32
    %87 = vector.broadcast %cst_22 : f32 to vector<8x96xf32>
    %88 = arith.addf %87, %86 : vector<8x96xf32>
    %89 = arith.divf %87, %88 : vector<8x96xf32>
    %90 = vector.extract_strided_slice %83 {offsets = [0, 96], sizes = [8, 32], strides = [1, 1]} : vector<8x128xf32> to vector<8x32xf32>
    %91 = math.tanh %90 : vector<8x32xf32>
    %92 = vector.extract_strided_slice %89 {offsets = [0, 32], sizes = [8, 32], strides = [1, 1]} : vector<8x96xf32> to vector<8x32xf32>
    %93 = arith.mulf %92, %55 : vector<8x32xf32>
    %94 = vector.extract_strided_slice %89 {offsets = [0, 0], sizes = [8, 32], strides = [1, 1]} : vector<8x96xf32> to vector<8x32xf32>
    %95 = arith.mulf %94, %91 : vector<8x32xf32>
    %96 = arith.addf %93, %95 : vector<8x32xf32>
    %97 = vector.extract_strided_slice %89 {offsets = [0, 64], sizes = [8, 32], strides = [1, 1]} : vector<8x96xf32> to vector<8x32xf32>
    %98 = math.tanh %96 : vector<8x32xf32>
    %99 = arith.mulf %97, %98 : vector<8x32xf32>
    %100 = vector.extract_strided_slice %80 {offsets = [0, 128], sizes = [8, 128], strides = [1, 1]} : vector<8x384xf32> to vector<8x128xf32>
    %101 = vector.extract_strided_slice %100 {offsets = [0, 0], sizes = [8, 96], strides = [1, 1]} : vector<8x128xf32> to vector<8x96xf32>
    %102 = arith.negf %101 : vector<8x96xf32>
    %103 = math.exp %102 : vector<8x96xf32>
    %cst_23 = arith.constant 1.000000e+00 : f32
    %104 = vector.broadcast %cst_23 : f32 to vector<8x96xf32>
    %105 = arith.addf %104, %103 : vector<8x96xf32>
    %106 = arith.divf %104, %105 : vector<8x96xf32>
    %107 = vector.extract_strided_slice %100 {offsets = [0, 96], sizes = [8, 32], strides = [1, 1]} : vector<8x128xf32> to vector<8x32xf32>
    %108 = math.tanh %107 : vector<8x32xf32>
    %109 = vector.extract_strided_slice %106 {offsets = [0, 32], sizes = [8, 32], strides = [1, 1]} : vector<8x96xf32> to vector<8x32xf32>
    %110 = arith.mulf %109, %72 : vector<8x32xf32>
    %111 = vector.extract_strided_slice %106 {offsets = [0, 0], sizes = [8, 32], strides = [1, 1]} : vector<8x96xf32> to vector<8x32xf32>
    %112 = arith.mulf %111, %108 : vector<8x32xf32>
    %113 = arith.addf %110, %112 : vector<8x32xf32>
    %114 = vector.extract_strided_slice %106 {offsets = [0, 64], sizes = [8, 32], strides = [1, 1]} : vector<8x96xf32> to vector<8x32xf32>
    %115 = math.tanh %113 : vector<8x32xf32>
    %116 = arith.mulf %114, %115 : vector<8x32xf32>
    %117 = vector.extract_strided_slice %80 {offsets = [0, 256], sizes = [8, 128], strides = [1, 1]} : vector<8x384xf32> to vector<8x128xf32>
    %118 = vector.extract_strided_slice %117 {offsets = [0, 0], sizes = [8, 96], strides = [1, 1]} : vector<8x128xf32> to vector<8x96xf32>
    %119 = arith.negf %118 : vector<8x96xf32>
    %120 = math.exp %119 : vector<8x96xf32>
    %cst_24 = arith.constant 1.000000e+00 : f32
    %121 = vector.broadcast %cst_24 : f32 to vector<8x96xf32>
    %122 = arith.addf %121, %120 : vector<8x96xf32>
    %123 = arith.divf %121, %122 : vector<8x96xf32>
    %124 = vector.extract_strided_slice %117 {offsets = [0, 96], sizes = [8, 32], strides = [1, 1]} : vector<8x128xf32> to vector<8x32xf32>
    %125 = math.tanh %124 : vector<8x32xf32>
    %126 = vector.extract_strided_slice %123 {offsets = [0, 32], sizes = [8, 32], strides = [1, 1]} : vector<8x96xf32> to vector<8x32xf32>
    %127 = arith.mulf %126, %10 : vector<8x32xf32>
    %128 = vector.extract_strided_slice %123 {offsets = [0, 0], sizes = [8, 32], strides = [1, 1]} : vector<8x96xf32> to vector<8x32xf32>
    %129 = arith.mulf %128, %125 : vector<8x32xf32>
    %130 = arith.addf %127, %129 : vector<8x32xf32>
    %131 = vector.extract_strided_slice %123 {offsets = [0, 64], sizes = [8, 32], strides = [1, 1]} : vector<8x96xf32> to vector<8x32xf32>
    %132 = math.tanh %130 : vector<8x32xf32>
    %133 = arith.mulf %131, %132 : vector<8x32xf32>
    %134 = tpu.concatenate %99, %116, %133 in 1 : vector<8x32xf32>, vector<8x32xf32>, vector<8x32xf32> -> vector<8x96xf32>
    %135 = arith.truncf %134 : vector<8x96xf32> to vector<8x96xbf16>
    %cst_25 = arith.constant dense<0.000000e+00> : vector<8x384xf32>
    %136 = tpu.matmul %135, %8, %cst_25 {dimension_numbers = #tpu.dot_dimension_numbers<[1], [0], [0], [1], [0, 0, 1, 1], [], []>} : vector<8x96xbf16>, vector<96x384xbf16>, vector<8x384xf32> -> vector<8x384xf32>
    %137 = vector.broadcast %9 : vector<1x384xf32> to vector<8x384xf32>
    %138 = arith.addf %136, %137 : vector<8x384xf32>
    %139 = vector.extract_strided_slice %138 {offsets = [0, 0], sizes = [8, 128], strides = [1, 1]} : vector<8x384xf32> to vector<8x128xf32>
    %c24 = arith.constant 24 : index
    %c0_26 = arith.constant 0 : index
    %140 = vector.load %arg10[%c24, %c0_26] : memref<64x128xf32, #tpu.memory_space<vmem>>, vector<8x128xf32>
    %141 = arith.addf %139, %140 : vector<8x128xf32>
    %142 = vector.extract_strided_slice %141 {offsets = [0, 0], sizes = [8, 96], strides = [1, 1]} : vector<8x128xf32> to vector<8x96xf32>
    %143 = arith.negf %142 : vector<8x96xf32>
    %144 = math.exp %143 : vector<8x96xf32>
    %cst_27 = arith.constant 1.000000e+00 : f32
    %145 = vector.broadcast %cst_27 : f32 to vector<8x96xf32>
    %146 = arith.addf %145, %144 : vector<8x96xf32>
    %147 = arith.divf %145, %146 : vector<8x96xf32>
    %148 = vector.extract_strided_slice %141 {offsets = [0, 96], sizes = [8, 32], strides = [1, 1]} : vector<8x128xf32> to vector<8x32xf32>
    %149 = math.tanh %148 : vector<8x32xf32>
    %150 = vector.extract_strided_slice %147 {offsets = [0, 32], sizes = [8, 32], strides = [1, 1]} : vector<8x96xf32> to vector<8x32xf32>
    %151 = arith.mulf %150, %96 : vector<8x32xf32>
    %152 = vector.extract_strided_slice %147 {offsets = [0, 0], sizes = [8, 32], strides = [1, 1]} : vector<8x96xf32> to vector<8x32xf32>
    %153 = arith.mulf %152, %149 : vector<8x32xf32>
    %154 = arith.addf %151, %153 : vector<8x32xf32>
    %155 = vector.extract_strided_slice %147 {offsets = [0, 64], sizes = [8, 32], strides = [1, 1]} : vector<8x96xf32> to vector<8x32xf32>
    %156 = math.tanh %154 : vector<8x32xf32>
    %157 = arith.mulf %155, %156 : vector<8x32xf32>
    %158 = vector.extract_strided_slice %138 {offsets = [0, 128], sizes = [8, 128], strides = [1, 1]} : vector<8x384xf32> to vector<8x128xf32>
    %159 = vector.extract_strided_slice %158 {offsets = [0, 0], sizes = [8, 96], strides = [1, 1]} : vector<8x128xf32> to vector<8x96xf32>
    %160 = arith.negf %159 : vector<8x96xf32>
    %161 = math.exp %160 : vector<8x96xf32>
    %cst_28 = arith.constant 1.000000e+00 : f32
    %162 = vector.broadcast %cst_28 : f32 to vector<8x96xf32>
    %163 = arith.addf %162, %161 : vector<8x96xf32>
    %164 = arith.divf %162, %163 : vector<8x96xf32>
    %165 = vector.extract_strided_slice %158 {offsets = [0, 96], sizes = [8, 32], strides = [1, 1]} : vector<8x128xf32> to vector<8x32xf32>
    %166 = math.tanh %165 : vector<8x32xf32>
    %167 = vector.extract_strided_slice %164 {offsets = [0, 32], sizes = [8, 32], strides = [1, 1]} : vector<8x96xf32> to vector<8x32xf32>
    %168 = arith.mulf %167, %113 : vector<8x32xf32>
    %169 = vector.extract_strided_slice %164 {offsets = [0, 0], sizes = [8, 32], strides = [1, 1]} : vector<8x96xf32> to vector<8x32xf32>
    %170 = arith.mulf %169, %166 : vector<8x32xf32>
    %171 = arith.addf %168, %170 : vector<8x32xf32>
    %172 = vector.extract_strided_slice %164 {offsets = [0, 64], sizes = [8, 32], strides = [1, 1]} : vector<8x96xf32> to vector<8x32xf32>
    %173 = math.tanh %171 : vector<8x32xf32>
    %174 = arith.mulf %172, %173 : vector<8x32xf32>
    %175 = vector.extract_strided_slice %138 {offsets = [0, 256], sizes = [8, 128], strides = [1, 1]} : vector<8x384xf32> to vector<8x128xf32>
    %176 = vector.extract_strided_slice %175 {offsets = [0, 0], sizes = [8, 96], strides = [1, 1]} : vector<8x128xf32> to vector<8x96xf32>
    %177 = arith.negf %176 : vector<8x96xf32>
    %178 = math.exp %177 : vector<8x96xf32>
    %cst_29 = arith.constant 1.000000e+00 : f32
    %179 = vector.broadcast %cst_29 : f32 to vector<8x96xf32>
    %180 = arith.addf %179, %178 : vector<8x96xf32>
    %181 = arith.divf %179, %180 : vector<8x96xf32>
    %182 = vector.extract_strided_slice %175 {offsets = [0, 96], sizes = [8, 32], strides = [1, 1]} : vector<8x128xf32> to vector<8x32xf32>
    %183 = math.tanh %182 : vector<8x32xf32>
    %184 = vector.extract_strided_slice %181 {offsets = [0, 32], sizes = [8, 32], strides = [1, 1]} : vector<8x96xf32> to vector<8x32xf32>
    %185 = arith.mulf %184, %130 : vector<8x32xf32>
    %186 = vector.extract_strided_slice %181 {offsets = [0, 0], sizes = [8, 32], strides = [1, 1]} : vector<8x96xf32> to vector<8x32xf32>
    %187 = arith.mulf %186, %183 : vector<8x32xf32>
    %188 = arith.addf %185, %187 : vector<8x32xf32>
    %189 = vector.extract_strided_slice %181 {offsets = [0, 64], sizes = [8, 32], strides = [1, 1]} : vector<8x96xf32> to vector<8x32xf32>
    %190 = math.tanh %188 : vector<8x32xf32>
    %191 = arith.mulf %189, %190 : vector<8x32xf32>
    %192 = tpu.concatenate %157, %174, %191 in 1 : vector<8x32xf32>, vector<8x32xf32>, vector<8x32xf32> -> vector<8x96xf32>
    %193 = arith.truncf %192 : vector<8x96xf32> to vector<8x96xbf16>
    %cst_30 = arith.constant dense<0.000000e+00> : vector<8x384xf32>
    %194 = tpu.matmul %193, %8, %cst_30 {dimension_numbers = #tpu.dot_dimension_numbers<[1], [0], [0], [1], [0, 0, 1, 1], [], []>} : vector<8x96xbf16>, vector<96x384xbf16>, vector<8x384xf32> -> vector<8x384xf32>
    %195 = vector.broadcast %9 : vector<1x384xf32> to vector<8x384xf32>
    %196 = arith.addf %194, %195 : vector<8x384xf32>
    %197 = vector.extract_strided_slice %196 {offsets = [0, 0], sizes = [8, 128], strides = [1, 1]} : vector<8x384xf32> to vector<8x128xf32>
    %c32 = arith.constant 32 : index
    %c0_31 = arith.constant 0 : index
    %198 = vector.load %arg10[%c32, %c0_31] : memref<64x128xf32, #tpu.memory_space<vmem>>, vector<8x128xf32>
    %199 = arith.addf %197, %198 : vector<8x128xf32>
    %200 = vector.extract_strided_slice %199 {offsets = [0, 0], sizes = [8, 96], strides = [1, 1]} : vector<8x128xf32> to vector<8x96xf32>
    %201 = arith.negf %200 : vector<8x96xf32>
    %202 = math.exp %201 : vector<8x96xf32>
    %cst_32 = arith.constant 1.000000e+00 : f32
    %203 = vector.broadcast %cst_32 : f32 to vector<8x96xf32>
    %204 = arith.addf %203, %202 : vector<8x96xf32>
    %205 = arith.divf %203, %204 : vector<8x96xf32>
    %206 = vector.extract_strided_slice %199 {offsets = [0, 96], sizes = [8, 32], strides = [1, 1]} : vector<8x128xf32> to vector<8x32xf32>
    %207 = math.tanh %206 : vector<8x32xf32>
    %208 = vector.extract_strided_slice %205 {offsets = [0, 32], sizes = [8, 32], strides = [1, 1]} : vector<8x96xf32> to vector<8x32xf32>
    %209 = arith.mulf %208, %154 : vector<8x32xf32>
    %210 = vector.extract_strided_slice %205 {offsets = [0, 0], sizes = [8, 32], strides = [1, 1]} : vector<8x96xf32> to vector<8x32xf32>
    %211 = arith.mulf %210, %207 : vector<8x32xf32>
    %212 = arith.addf %209, %211 : vector<8x32xf32>
    %213 = vector.extract_strided_slice %205 {offsets = [0, 64], sizes = [8, 32], strides = [1, 1]} : vector<8x96xf32> to vector<8x32xf32>
    %214 = math.tanh %212 : vector<8x32xf32>
    %215 = arith.mulf %213, %214 : vector<8x32xf32>
    %216 = vector.extract_strided_slice %196 {offsets = [0, 128], sizes = [8, 128], strides = [1, 1]} : vector<8x384xf32> to vector<8x128xf32>
    %217 = vector.extract_strided_slice %216 {offsets = [0, 0], sizes = [8, 96], strides = [1, 1]} : vector<8x128xf32> to vector<8x96xf32>
    %218 = arith.negf %217 : vector<8x96xf32>
    %219 = math.exp %218 : vector<8x96xf32>
    %cst_33 = arith.constant 1.000000e+00 : f32
    %220 = vector.broadcast %cst_33 : f32 to vector<8x96xf32>
    %221 = arith.addf %220, %219 : vector<8x96xf32>
    %222 = arith.divf %220, %221 : vector<8x96xf32>
    %223 = vector.extract_strided_slice %216 {offsets = [0, 96], sizes = [8, 32], strides = [1, 1]} : vector<8x128xf32> to vector<8x32xf32>
    %224 = math.tanh %223 : vector<8x32xf32>
    %225 = vector.extract_strided_slice %222 {offsets = [0, 32], sizes = [8, 32], strides = [1, 1]} : vector<8x96xf32> to vector<8x32xf32>
    %226 = arith.mulf %225, %171 : vector<8x32xf32>
    %227 = vector.extract_strided_slice %222 {offsets = [0, 0], sizes = [8, 32], strides = [1, 1]} : vector<8x96xf32> to vector<8x32xf32>
    %228 = arith.mulf %227, %224 : vector<8x32xf32>
    %229 = arith.addf %226, %228 : vector<8x32xf32>
    %230 = vector.extract_strided_slice %222 {offsets = [0, 64], sizes = [8, 32], strides = [1, 1]} : vector<8x96xf32> to vector<8x32xf32>
    %231 = math.tanh %229 : vector<8x32xf32>
    %232 = arith.mulf %230, %231 : vector<8x32xf32>
    %233 = vector.extract_strided_slice %196 {offsets = [0, 256], sizes = [8, 128], strides = [1, 1]} : vector<8x384xf32> to vector<8x128xf32>
    %234 = vector.extract_strided_slice %233 {offsets = [0, 0], sizes = [8, 96], strides = [1, 1]} : vector<8x128xf32> to vector<8x96xf32>
    %235 = arith.negf %234 : vector<8x96xf32>
    %236 = math.exp %235 : vector<8x96xf32>
    %cst_34 = arith.constant 1.000000e+00 : f32
    %237 = vector.broadcast %cst_34 : f32 to vector<8x96xf32>
    %238 = arith.addf %237, %236 : vector<8x96xf32>
    %239 = arith.divf %237, %238 : vector<8x96xf32>
    %240 = vector.extract_strided_slice %233 {offsets = [0, 96], sizes = [8, 32], strides = [1, 1]} : vector<8x128xf32> to vector<8x32xf32>
    %241 = math.tanh %240 : vector<8x32xf32>
    %242 = vector.extract_strided_slice %239 {offsets = [0, 32], sizes = [8, 32], strides = [1, 1]} : vector<8x96xf32> to vector<8x32xf32>
    %243 = arith.mulf %242, %188 : vector<8x32xf32>
    %244 = vector.extract_strided_slice %239 {offsets = [0, 0], sizes = [8, 32], strides = [1, 1]} : vector<8x96xf32> to vector<8x32xf32>
    %245 = arith.mulf %244, %241 : vector<8x32xf32>
    %246 = arith.addf %243, %245 : vector<8x32xf32>
    %247 = vector.extract_strided_slice %239 {offsets = [0, 64], sizes = [8, 32], strides = [1, 1]} : vector<8x96xf32> to vector<8x32xf32>
    %248 = math.tanh %246 : vector<8x32xf32>
    %249 = arith.mulf %247, %248 : vector<8x32xf32>
    %250 = tpu.concatenate %215, %232, %249 in 1 : vector<8x32xf32>, vector<8x32xf32>, vector<8x32xf32> -> vector<8x96xf32>
    %251 = arith.truncf %250 : vector<8x96xf32> to vector<8x96xbf16>
    %cst_35 = arith.constant dense<0.000000e+00> : vector<8x384xf32>
    %252 = tpu.matmul %251, %8, %cst_35 {dimension_numbers = #tpu.dot_dimension_numbers<[1], [0], [0], [1], [0, 0, 1, 1], [], []>} : vector<8x96xbf16>, vector<96x384xbf16>, vector<8x384xf32> -> vector<8x384xf32>
    %253 = vector.broadcast %9 : vector<1x384xf32> to vector<8x384xf32>
    %254 = arith.addf %252, %253 : vector<8x384xf32>
    %255 = vector.extract_strided_slice %254 {offsets = [0, 0], sizes = [8, 128], strides = [1, 1]} : vector<8x384xf32> to vector<8x128xf32>
    %c40 = arith.constant 40 : index
    %c0_36 = arith.constant 0 : index
    %256 = vector.load %arg10[%c40, %c0_36] : memref<64x128xf32, #tpu.memory_space<vmem>>, vector<8x128xf32>
    %257 = arith.addf %255, %256 : vector<8x128xf32>
    %258 = vector.extract_strided_slice %257 {offsets = [0, 0], sizes = [8, 96], strides = [1, 1]} : vector<8x128xf32> to vector<8x96xf32>
    %259 = arith.negf %258 : vector<8x96xf32>
    %260 = math.exp %259 : vector<8x96xf32>
    %cst_37 = arith.constant 1.000000e+00 : f32
    %261 = vector.broadcast %cst_37 : f32 to vector<8x96xf32>
    %262 = arith.addf %261, %260 : vector<8x96xf32>
    %263 = arith.divf %261, %262 : vector<8x96xf32>
    %264 = vector.extract_strided_slice %257 {offsets = [0, 96], sizes = [8, 32], strides = [1, 1]} : vector<8x128xf32> to vector<8x32xf32>
    %265 = math.tanh %264 : vector<8x32xf32>
    %266 = vector.extract_strided_slice %263 {offsets = [0, 32], sizes = [8, 32], strides = [1, 1]} : vector<8x96xf32> to vector<8x32xf32>
    %267 = arith.mulf %266, %212 : vector<8x32xf32>
    %268 = vector.extract_strided_slice %263 {offsets = [0, 0], sizes = [8, 32], strides = [1, 1]} : vector<8x96xf32> to vector<8x32xf32>
    %269 = arith.mulf %268, %265 : vector<8x32xf32>
    %270 = arith.addf %267, %269 : vector<8x32xf32>
    %271 = vector.extract_strided_slice %263 {offsets = [0, 64], sizes = [8, 32], strides = [1, 1]} : vector<8x96xf32> to vector<8x32xf32>
    %272 = math.tanh %270 : vector<8x32xf32>
    %273 = arith.mulf %271, %272 : vector<8x32xf32>
    %274 = vector.extract_strided_slice %254 {offsets = [0, 128], sizes = [8, 128], strides = [1, 1]} : vector<8x384xf32> to vector<8x128xf32>
    %275 = vector.extract_strided_slice %274 {offsets = [0, 0], sizes = [8, 96], strides = [1, 1]} : vector<8x128xf32> to vector<8x96xf32>
    %276 = arith.negf %275 : vector<8x96xf32>
    %277 = math.exp %276 : vector<8x96xf32>
    %cst_38 = arith.constant 1.000000e+00 : f32
    %278 = vector.broadcast %cst_38 : f32 to vector<8x96xf32>
    %279 = arith.addf %278, %277 : vector<8x96xf32>
    %280 = arith.divf %278, %279 : vector<8x96xf32>
    %281 = vector.extract_strided_slice %274 {offsets = [0, 96], sizes = [8, 32], strides = [1, 1]} : vector<8x128xf32> to vector<8x32xf32>
    %282 = math.tanh %281 : vector<8x32xf32>
    %283 = vector.extract_strided_slice %280 {offsets = [0, 32], sizes = [8, 32], strides = [1, 1]} : vector<8x96xf32> to vector<8x32xf32>
    %284 = arith.mulf %283, %229 : vector<8x32xf32>
    %285 = vector.extract_strided_slice %280 {offsets = [0, 0], sizes = [8, 32], strides = [1, 1]} : vector<8x96xf32> to vector<8x32xf32>
    %286 = arith.mulf %285, %282 : vector<8x32xf32>
    %287 = arith.addf %284, %286 : vector<8x32xf32>
    %288 = vector.extract_strided_slice %280 {offsets = [0, 64], sizes = [8, 32], strides = [1, 1]} : vector<8x96xf32> to vector<8x32xf32>
    %289 = math.tanh %287 : vector<8x32xf32>
    %290 = arith.mulf %288, %289 : vector<8x32xf32>
    %291 = vector.extract_strided_slice %254 {offsets = [0, 256], sizes = [8, 128], strides = [1, 1]} : vector<8x384xf32> to vector<8x128xf32>
    %292 = vector.extract_strided_slice %291 {offsets = [0, 0], sizes = [8, 96], strides = [1, 1]} : vector<8x128xf32> to vector<8x96xf32>
    %293 = arith.negf %292 : vector<8x96xf32>
    %294 = math.exp %293 : vector<8x96xf32>
    %cst_39 = arith.constant 1.000000e+00 : f32
    %295 = vector.broadcast %cst_39 : f32 to vector<8x96xf32>
    %296 = arith.addf %295, %294 : vector<8x96xf32>
    %297 = arith.divf %295, %296 : vector<8x96xf32>
    %298 = vector.extract_strided_slice %291 {offsets = [0, 96], sizes = [8, 32], strides = [1, 1]} : vector<8x128xf32> to vector<8x32xf32>
    %299 = math.tanh %298 : vector<8x32xf32>
    %300 = vector.extract_strided_slice %297 {offsets = [0, 32], sizes = [8, 32], strides = [1, 1]} : vector<8x96xf32> to vector<8x32xf32>
    %301 = arith.mulf %300, %246 : vector<8x32xf32>
    %302 = vector.extract_strided_slice %297 {offsets = [0, 0], sizes = [8, 32], strides = [1, 1]} : vector<8x96xf32> to vector<8x32xf32>
    %303 = arith.mulf %302, %299 : vector<8x32xf32>
    %304 = arith.addf %301, %303 : vector<8x32xf32>
    %305 = vector.extract_strided_slice %297 {offsets = [0, 64], sizes = [8, 32], strides = [1, 1]} : vector<8x96xf32> to vector<8x32xf32>
    %306 = math.tanh %304 : vector<8x32xf32>
    %307 = arith.mulf %305, %306 : vector<8x32xf32>
    %308 = tpu.concatenate %273, %290, %307 in 1 : vector<8x32xf32>, vector<8x32xf32>, vector<8x32xf32> -> vector<8x96xf32>
    %309 = arith.truncf %308 : vector<8x96xf32> to vector<8x96xbf16>
    %cst_40 = arith.constant dense<0.000000e+00> : vector<8x384xf32>
    %310 = tpu.matmul %309, %8, %cst_40 {dimension_numbers = #tpu.dot_dimension_numbers<[1], [0], [0], [1], [0, 0, 1, 1], [], []>} : vector<8x96xbf16>, vector<96x384xbf16>, vector<8x384xf32> -> vector<8x384xf32>
    %311 = vector.broadcast %9 : vector<1x384xf32> to vector<8x384xf32>
    %312 = arith.addf %310, %311 : vector<8x384xf32>
    %313 = vector.extract_strided_slice %312 {offsets = [0, 0], sizes = [8, 128], strides = [1, 1]} : vector<8x384xf32> to vector<8x128xf32>
    %c48 = arith.constant 48 : index
    %c0_41 = arith.constant 0 : index
    %314 = vector.load %arg10[%c48, %c0_41] : memref<64x128xf32, #tpu.memory_space<vmem>>, vector<8x128xf32>
    %315 = arith.addf %313, %314 : vector<8x128xf32>
    %316 = vector.extract_strided_slice %315 {offsets = [0, 0], sizes = [8, 96], strides = [1, 1]} : vector<8x128xf32> to vector<8x96xf32>
    %317 = arith.negf %316 : vector<8x96xf32>
    %318 = math.exp %317 : vector<8x96xf32>
    %cst_42 = arith.constant 1.000000e+00 : f32
    %319 = vector.broadcast %cst_42 : f32 to vector<8x96xf32>
    %320 = arith.addf %319, %318 : vector<8x96xf32>
    %321 = arith.divf %319, %320 : vector<8x96xf32>
    %322 = vector.extract_strided_slice %315 {offsets = [0, 96], sizes = [8, 32], strides = [1, 1]} : vector<8x128xf32> to vector<8x32xf32>
    %323 = math.tanh %322 : vector<8x32xf32>
    %324 = vector.extract_strided_slice %321 {offsets = [0, 32], sizes = [8, 32], strides = [1, 1]} : vector<8x96xf32> to vector<8x32xf32>
    %325 = arith.mulf %324, %270 : vector<8x32xf32>
    %326 = vector.extract_strided_slice %321 {offsets = [0, 0], sizes = [8, 32], strides = [1, 1]} : vector<8x96xf32> to vector<8x32xf32>
    %327 = arith.mulf %326, %323 : vector<8x32xf32>
    %328 = arith.addf %325, %327 : vector<8x32xf32>
    %329 = vector.extract_strided_slice %321 {offsets = [0, 64], sizes = [8, 32], strides = [1, 1]} : vector<8x96xf32> to vector<8x32xf32>
    %330 = math.tanh %328 : vector<8x32xf32>
    %331 = arith.mulf %329, %330 : vector<8x32xf32>
    %332 = vector.extract_strided_slice %312 {offsets = [0, 128], sizes = [8, 128], strides = [1, 1]} : vector<8x384xf32> to vector<8x128xf32>
    %333 = vector.extract_strided_slice %332 {offsets = [0, 0], sizes = [8, 96], strides = [1, 1]} : vector<8x128xf32> to vector<8x96xf32>
    %334 = arith.negf %333 : vector<8x96xf32>
    %335 = math.exp %334 : vector<8x96xf32>
    %cst_43 = arith.constant 1.000000e+00 : f32
    %336 = vector.broadcast %cst_43 : f32 to vector<8x96xf32>
    %337 = arith.addf %336, %335 : vector<8x96xf32>
    %338 = arith.divf %336, %337 : vector<8x96xf32>
    %339 = vector.extract_strided_slice %332 {offsets = [0, 96], sizes = [8, 32], strides = [1, 1]} : vector<8x128xf32> to vector<8x32xf32>
    %340 = math.tanh %339 : vector<8x32xf32>
    %341 = vector.extract_strided_slice %338 {offsets = [0, 32], sizes = [8, 32], strides = [1, 1]} : vector<8x96xf32> to vector<8x32xf32>
    %342 = arith.mulf %341, %287 : vector<8x32xf32>
    %343 = vector.extract_strided_slice %338 {offsets = [0, 0], sizes = [8, 32], strides = [1, 1]} : vector<8x96xf32> to vector<8x32xf32>
    %344 = arith.mulf %343, %340 : vector<8x32xf32>
    %345 = arith.addf %342, %344 : vector<8x32xf32>
    %346 = vector.extract_strided_slice %338 {offsets = [0, 64], sizes = [8, 32], strides = [1, 1]} : vector<8x96xf32> to vector<8x32xf32>
    %347 = math.tanh %345 : vector<8x32xf32>
    %348 = arith.mulf %346, %347 : vector<8x32xf32>
    %349 = vector.extract_strided_slice %312 {offsets = [0, 256], sizes = [8, 128], strides = [1, 1]} : vector<8x384xf32> to vector<8x128xf32>
    %350 = vector.extract_strided_slice %349 {offsets = [0, 0], sizes = [8, 96], strides = [1, 1]} : vector<8x128xf32> to vector<8x96xf32>
    %351 = arith.negf %350 : vector<8x96xf32>
    %352 = math.exp %351 : vector<8x96xf32>
    %cst_44 = arith.constant 1.000000e+00 : f32
    %353 = vector.broadcast %cst_44 : f32 to vector<8x96xf32>
    %354 = arith.addf %353, %352 : vector<8x96xf32>
    %355 = arith.divf %353, %354 : vector<8x96xf32>
    %356 = vector.extract_strided_slice %349 {offsets = [0, 96], sizes = [8, 32], strides = [1, 1]} : vector<8x128xf32> to vector<8x32xf32>
    %357 = math.tanh %356 : vector<8x32xf32>
    %358 = vector.extract_strided_slice %355 {offsets = [0, 32], sizes = [8, 32], strides = [1, 1]} : vector<8x96xf32> to vector<8x32xf32>
    %359 = arith.mulf %358, %304 : vector<8x32xf32>
    %360 = vector.extract_strided_slice %355 {offsets = [0, 0], sizes = [8, 32], strides = [1, 1]} : vector<8x96xf32> to vector<8x32xf32>
    %361 = arith.mulf %360, %357 : vector<8x32xf32>
    %362 = arith.addf %359, %361 : vector<8x32xf32>
    %363 = vector.extract_strided_slice %355 {offsets = [0, 64], sizes = [8, 32], strides = [1, 1]} : vector<8x96xf32> to vector<8x32xf32>
    %364 = math.tanh %362 : vector<8x32xf32>
    %365 = arith.mulf %363, %364 : vector<8x32xf32>
    %366 = tpu.concatenate %331, %348, %365 in 1 : vector<8x32xf32>, vector<8x32xf32>, vector<8x32xf32> -> vector<8x96xf32>
    %367 = arith.truncf %366 : vector<8x96xf32> to vector<8x96xbf16>
    %cst_45 = arith.constant dense<0.000000e+00> : vector<8x384xf32>
    %368 = tpu.matmul %367, %8, %cst_45 {dimension_numbers = #tpu.dot_dimension_numbers<[1], [0], [0], [1], [0, 0, 1, 1], [], []>} : vector<8x96xbf16>, vector<96x384xbf16>, vector<8x384xf32> -> vector<8x384xf32>
    %369 = vector.broadcast %9 : vector<1x384xf32> to vector<8x384xf32>
    %370 = arith.addf %368, %369 : vector<8x384xf32>
    %371 = vector.extract_strided_slice %370 {offsets = [0, 0], sizes = [8, 128], strides = [1, 1]} : vector<8x384xf32> to vector<8x128xf32>
    %c56 = arith.constant 56 : index
    %c0_46 = arith.constant 0 : index
    %372 = vector.load %arg10[%c56, %c0_46] : memref<64x128xf32, #tpu.memory_space<vmem>>, vector<8x128xf32>
    %373 = arith.addf %371, %372 : vector<8x128xf32>
    %374 = vector.extract_strided_slice %373 {offsets = [0, 0], sizes = [8, 96], strides = [1, 1]} : vector<8x128xf32> to vector<8x96xf32>
    %375 = arith.negf %374 : vector<8x96xf32>
    %376 = math.exp %375 : vector<8x96xf32>
    %cst_47 = arith.constant 1.000000e+00 : f32
    %377 = vector.broadcast %cst_47 : f32 to vector<8x96xf32>
    %378 = arith.addf %377, %376 : vector<8x96xf32>
    %379 = arith.divf %377, %378 : vector<8x96xf32>
    %380 = vector.extract_strided_slice %373 {offsets = [0, 96], sizes = [8, 32], strides = [1, 1]} : vector<8x128xf32> to vector<8x32xf32>
    %381 = math.tanh %380 : vector<8x32xf32>
    %382 = vector.extract_strided_slice %379 {offsets = [0, 32], sizes = [8, 32], strides = [1, 1]} : vector<8x96xf32> to vector<8x32xf32>
    %383 = arith.mulf %382, %328 : vector<8x32xf32>
    %384 = vector.extract_strided_slice %379 {offsets = [0, 0], sizes = [8, 32], strides = [1, 1]} : vector<8x96xf32> to vector<8x32xf32>
    %385 = arith.mulf %384, %381 : vector<8x32xf32>
    %386 = arith.addf %383, %385 : vector<8x32xf32>
    %387 = vector.extract_strided_slice %379 {offsets = [0, 64], sizes = [8, 32], strides = [1, 1]} : vector<8x96xf32> to vector<8x32xf32>
    %388 = math.tanh %386 : vector<8x32xf32>
    %389 = arith.mulf %387, %388 : vector<8x32xf32>
    %390 = vector.extract_strided_slice %370 {offsets = [0, 128], sizes = [8, 128], strides = [1, 1]} : vector<8x384xf32> to vector<8x128xf32>
    %391 = vector.extract_strided_slice %390 {offsets = [0, 0], sizes = [8, 96], strides = [1, 1]} : vector<8x128xf32> to vector<8x96xf32>
    %392 = arith.negf %391 : vector<8x96xf32>
    %393 = math.exp %392 : vector<8x96xf32>
    %cst_48 = arith.constant 1.000000e+00 : f32
    %394 = vector.broadcast %cst_48 : f32 to vector<8x96xf32>
    %395 = arith.addf %394, %393 : vector<8x96xf32>
    %396 = arith.divf %394, %395 : vector<8x96xf32>
    %397 = vector.extract_strided_slice %390 {offsets = [0, 96], sizes = [8, 32], strides = [1, 1]} : vector<8x128xf32> to vector<8x32xf32>
    %398 = math.tanh %397 : vector<8x32xf32>
    %399 = vector.extract_strided_slice %396 {offsets = [0, 32], sizes = [8, 32], strides = [1, 1]} : vector<8x96xf32> to vector<8x32xf32>
    %400 = arith.mulf %399, %345 : vector<8x32xf32>
    %401 = vector.extract_strided_slice %396 {offsets = [0, 0], sizes = [8, 32], strides = [1, 1]} : vector<8x96xf32> to vector<8x32xf32>
    %402 = arith.mulf %401, %398 : vector<8x32xf32>
    %403 = arith.addf %400, %402 : vector<8x32xf32>
    %404 = vector.extract_strided_slice %396 {offsets = [0, 64], sizes = [8, 32], strides = [1, 1]} : vector<8x96xf32> to vector<8x32xf32>
    %405 = math.tanh %403 : vector<8x32xf32>
    %406 = arith.mulf %404, %405 : vector<8x32xf32>
    %407 = vector.extract_strided_slice %370 {offsets = [0, 256], sizes = [8, 128], strides = [1, 1]} : vector<8x384xf32> to vector<8x128xf32>
    %408 = vector.extract_strided_slice %407 {offsets = [0, 0], sizes = [8, 96], strides = [1, 1]} : vector<8x128xf32> to vector<8x96xf32>
    %409 = arith.negf %408 : vector<8x96xf32>
    %410 = math.exp %409 : vector<8x96xf32>
    %cst_49 = arith.constant 1.000000e+00 : f32
    %411 = vector.broadcast %cst_49 : f32 to vector<8x96xf32>
    %412 = arith.addf %411, %410 : vector<8x96xf32>
    %413 = arith.divf %411, %412 : vector<8x96xf32>
    %414 = vector.extract_strided_slice %407 {offsets = [0, 96], sizes = [8, 32], strides = [1, 1]} : vector<8x128xf32> to vector<8x32xf32>
    %415 = math.tanh %414 : vector<8x32xf32>
    %416 = vector.extract_strided_slice %413 {offsets = [0, 32], sizes = [8, 32], strides = [1, 1]} : vector<8x96xf32> to vector<8x32xf32>
    %417 = arith.mulf %416, %362 : vector<8x32xf32>
    %418 = vector.extract_strided_slice %413 {offsets = [0, 0], sizes = [8, 32], strides = [1, 1]} : vector<8x96xf32> to vector<8x32xf32>
    %419 = arith.mulf %418, %415 : vector<8x32xf32>
    %420 = arith.addf %417, %419 : vector<8x32xf32>
    %421 = vector.extract_strided_slice %413 {offsets = [0, 64], sizes = [8, 32], strides = [1, 1]} : vector<8x96xf32> to vector<8x32xf32>
    %422 = math.tanh %420 : vector<8x32xf32>
    %423 = arith.mulf %421, %422 : vector<8x32xf32>
    %424 = tpu.concatenate %389, %406, %423 in 1 : vector<8x32xf32>, vector<8x32xf32>, vector<8x32xf32> -> vector<8x96xf32>
    %425 = arith.truncf %424 : vector<8x96xf32> to vector<8x96xbf16>
    %cst_50 = arith.constant dense<0.000000e+00> : vector<8x384xf32>
    %426 = tpu.matmul %425, %8, %cst_50 {dimension_numbers = #tpu.dot_dimension_numbers<[1], [0], [0], [1], [0, 0, 1, 1], [], []>} : vector<8x96xbf16>, vector<96x384xbf16>, vector<8x384xf32> -> vector<8x384xf32>
    %427 = vector.broadcast %9 : vector<1x384xf32> to vector<8x384xf32>
    %428 = arith.addf %426, %427 : vector<8x384xf32>
    %429 = vector.extract_strided_slice %428 {offsets = [0, 128], sizes = [8, 128], strides = [1, 1]} : vector<8x384xf32> to vector<8x128xf32>
    %430 = vector.extract_strided_slice %429 {offsets = [0, 0], sizes = [8, 96], strides = [1, 1]} : vector<8x128xf32> to vector<8x96xf32>
    %431 = arith.negf %430 : vector<8x96xf32>
    %432 = math.exp %431 : vector<8x96xf32>
    %cst_51 = arith.constant 1.000000e+00 : f32
    %433 = vector.broadcast %cst_51 : f32 to vector<8x96xf32>
    %434 = arith.addf %433, %432 : vector<8x96xf32>
    %435 = arith.divf %433, %434 : vector<8x96xf32>
    %436 = vector.extract_strided_slice %429 {offsets = [0, 96], sizes = [8, 32], strides = [1, 1]} : vector<8x128xf32> to vector<8x32xf32>
    %437 = math.tanh %436 : vector<8x32xf32>
    %438 = vector.extract_strided_slice %435 {offsets = [0, 32], sizes = [8, 32], strides = [1, 1]} : vector<8x96xf32> to vector<8x32xf32>
    %439 = arith.mulf %438, %403 : vector<8x32xf32>
    %440 = vector.extract_strided_slice %435 {offsets = [0, 0], sizes = [8, 32], strides = [1, 1]} : vector<8x96xf32> to vector<8x32xf32>
    %441 = arith.mulf %440, %437 : vector<8x32xf32>
    %442 = arith.addf %439, %441 : vector<8x32xf32>
    %443 = vector.extract_strided_slice %435 {offsets = [0, 64], sizes = [8, 32], strides = [1, 1]} : vector<8x96xf32> to vector<8x32xf32>
    %444 = math.tanh %442 : vector<8x32xf32>
    %445 = arith.mulf %443, %444 : vector<8x32xf32>
    %446 = vector.extract_strided_slice %428 {offsets = [0, 256], sizes = [8, 128], strides = [1, 1]} : vector<8x384xf32> to vector<8x128xf32>
    %447 = vector.extract_strided_slice %446 {offsets = [0, 0], sizes = [8, 96], strides = [1, 1]} : vector<8x128xf32> to vector<8x96xf32>
    %448 = arith.negf %447 : vector<8x96xf32>
    %449 = math.exp %448 : vector<8x96xf32>
    %cst_52 = arith.constant 1.000000e+00 : f32
    %450 = vector.broadcast %cst_52 : f32 to vector<8x96xf32>
    %451 = arith.addf %450, %449 : vector<8x96xf32>
    %452 = arith.divf %450, %451 : vector<8x96xf32>
    %453 = vector.extract_strided_slice %446 {offsets = [0, 96], sizes = [8, 32], strides = [1, 1]} : vector<8x128xf32> to vector<8x32xf32>
    %454 = math.tanh %453 : vector<8x32xf32>
    %455 = vector.extract_strided_slice %452 {offsets = [0, 32], sizes = [8, 32], strides = [1, 1]} : vector<8x96xf32> to vector<8x32xf32>
    %456 = arith.mulf %455, %420 : vector<8x32xf32>
    %457 = vector.extract_strided_slice %452 {offsets = [0, 0], sizes = [8, 32], strides = [1, 1]} : vector<8x96xf32> to vector<8x32xf32>
    %458 = arith.mulf %457, %454 : vector<8x32xf32>
    %459 = arith.addf %456, %458 : vector<8x32xf32>
    %460 = vector.extract_strided_slice %452 {offsets = [0, 64], sizes = [8, 32], strides = [1, 1]} : vector<8x96xf32> to vector<8x32xf32>
    %461 = math.tanh %459 : vector<8x32xf32>
    %462 = arith.mulf %460, %461 : vector<8x32xf32>
    %463 = tpu.concatenate %389, %445, %462 in 1 : vector<8x32xf32>, vector<8x32xf32>, vector<8x32xf32> -> vector<8x96xf32>
    %464 = arith.truncf %463 : vector<8x96xf32> to vector<8x96xbf16>
    %cst_53 = arith.constant dense<0.000000e+00> : vector<8x384xf32>
    %465 = tpu.matmul %464, %8, %cst_53 {dimension_numbers = #tpu.dot_dimension_numbers<[1], [0], [0], [1], [0, 0, 1, 1], [], []>} : vector<8x96xbf16>, vector<96x384xbf16>, vector<8x384xf32> -> vector<8x384xf32>
    %466 = vector.broadcast %9 : vector<1x384xf32> to vector<8x384xf32>
    %467 = arith.addf %465, %466 : vector<8x384xf32>
    %468 = vector.extract_strided_slice %467 {offsets = [0, 256], sizes = [8, 128], strides = [1, 1]} : vector<8x384xf32> to vector<8x128xf32>
    %469 = vector.extract_strided_slice %468 {offsets = [0, 0], sizes = [8, 96], strides = [1, 1]} : vector<8x128xf32> to vector<8x96xf32>
    %470 = arith.negf %469 : vector<8x96xf32>
    %471 = math.exp %470 : vector<8x96xf32>
    %cst_54 = arith.constant 1.000000e+00 : f32
    %472 = vector.broadcast %cst_54 : f32 to vector<8x96xf32>
    %473 = arith.addf %472, %471 : vector<8x96xf32>
    %474 = arith.divf %472, %473 : vector<8x96xf32>
    %475 = vector.extract_strided_slice %468 {offsets = [0, 96], sizes = [8, 32], strides = [1, 1]} : vector<8x128xf32> to vector<8x32xf32>
    %476 = math.tanh %475 : vector<8x32xf32>
    %477 = vector.extract_strided_slice %474 {offsets = [0, 32], sizes = [8, 32], strides = [1, 1]} : vector<8x96xf32> to vector<8x32xf32>
    %478 = arith.mulf %477, %459 : vector<8x32xf32>
    %479 = vector.extract_strided_slice %474 {offsets = [0, 0], sizes = [8, 32], strides = [1, 1]} : vector<8x96xf32> to vector<8x32xf32>
    %480 = arith.mulf %479, %476 : vector<8x32xf32>
    %481 = arith.addf %478, %480 : vector<8x32xf32>
    %482 = vector.extract_strided_slice %474 {offsets = [0, 64], sizes = [8, 32], strides = [1, 1]} : vector<8x96xf32> to vector<8x32xf32>
    %483 = math.tanh %481 : vector<8x32xf32>
    %484 = arith.mulf %482, %483 : vector<8x32xf32>
    %485 = arith.truncf %484 : vector<8x32xf32> to vector<8x32xbf16>
    %c0_55 = arith.constant 0 : index
    %c0_56 = arith.constant 0 : index
    %486 = vector.load %arg5[%c0_55, %c0_56] : memref<32x128xbf16, #tpu.memory_space<vmem>>, vector<32x128xbf16>
    %cst_57 = arith.constant dense<0.000000e+00> : vector<8x128xf32>
    %487 = tpu.matmul %485, %486, %cst_57 {dimension_numbers = #tpu.dot_dimension_numbers<[1], [0], [0], [1], [0, 0, 1, 1], [], []>} : vector<8x32xbf16>, vector<32x128xbf16>, vector<8x128xf32> -> vector<8x128xf32>
    %c0_58 = arith.constant 0 : index
    %c0_59 = arith.constant 0 : index
    %488 = vector.load %arg6[%c0_58, %c0_59] : memref<1x128xf32, #tpu.memory_space<vmem>>, vector<1x128xf32>
    %489 = vector.broadcast %488 : vector<1x128xf32> to vector<8x128xf32>
    %490 = arith.addf %487, %489 : vector<8x128xf32>
    %cst_60 = arith.constant 0.000000e+00 : f32
    %491 = vector.broadcast %cst_60 : f32 to vector<8x128xf32>
    %492 = arith.maximumf %490, %491 : vector<8x128xf32>
    %493 = arith.truncf %492 : vector<8x128xf32> to vector<8x128xbf16>
    %c0_61 = arith.constant 0 : index
    %c0_62 = arith.constant 0 : index
    %494 = vector.load %arg7[%c0_61, %c0_62] : memref<128x128xbf16, #tpu.memory_space<vmem>>, vector<128x128xbf16>
    %cst_63 = arith.constant dense<0.000000e+00> : vector<8x128xf32>
    %495 = tpu.matmul %493, %494, %cst_63 {dimension_numbers = #tpu.dot_dimension_numbers<[1], [0], [0], [1], [0, 0, 1, 1], [], []>} : vector<8x128xbf16>, vector<128x128xbf16>, vector<8x128xf32> -> vector<8x128xf32>
    %c0_64 = arith.constant 0 : index
    %c0_65 = arith.constant 0 : index
    %496 = vector.load %arg8[%c0_64, %c0_65] : memref<1x128xf32, #tpu.memory_space<vmem>>, vector<1x128xf32>
    %497 = vector.broadcast %496 : vector<1x128xf32> to vector<8x128xf32>
    %498 = arith.addf %495, %497 : vector<8x128xf32>
    %c0_66 = arith.constant 0 : index
    %c0_67 = arith.constant 0 : index
    %499 = vector.load %arg9[%c0_66, %c0_67] : memref<8x128xf32, #tpu.memory_space<vmem>>, vector<8x128xf32>
    tpu.vector_store %arg9[%c0_66, %c0_67], %498 {strides = array<i32>} : memref<8x128xf32, #tpu.memory_space<vmem>>, vector<8x128xf32>,
    return
  }
}

</mosaic_0001>

<bundles_post_ra>
// kernel: tpu_custom_call.1
= control target key start
LH: loop header
LB: loop body
LE: loop exit
PB: predicated region body
PF: predicated region fallthrough
CT: control target
= control target key end

     0   :  { %14 = vsyncpa [#allocation4], 0  ;;  %s3276_s0 = inlined_call_operand.vmem [shape: f32[64,16], index: 0, kind: input, shape index: {}]   ;;  %s3277_s1 = inlined_call_operand.vmem [shape: bf16[16,128], index: 1, kind: input, shape index: {}]   ;;  %s3278_s2 = inlined_call_operand.vmem [shape: f32[1,128], index: 2, kind: input, shape index: {}]   ;;  %s3279_s3 = inlined_call_operand.hbm [shape: bf16[96,384], index: 3, kind: input, shape index: {}]   ;;  %s3280_s4 = inlined_call_operand.vmem [shape: f32[1,384], index: 4, kind: input, shape index: {}]   ;;  %s3281_s5 = inlined_call_operand.vmem [shape: bf16[32,128], index: 5, kind: input, shape index: {}]   ;;  %s3282_s6 = inlined_call_operand.vmem [shape: f32[1,128], index: 6, kind: input, shape index: {}]   ;;  %s3283_s7 = inlined_call_operand.vmem [shape: bf16[128,128], index: 7, kind: input, shape index: {}]   ;;  %s3284_s8 = inlined_call_operand.vmem [shape: f32[1,128], index: 8, kind: input, shape index: {}]   ;;  %s3285_s9 = inlined_call_operand.hbm [shape: f32[8,128], index: 9, kind: output, shape index: {}]  }
   0x1   :  { %15 = vsyncpa [#allocation5], 0  ;;  %s2522_s30 = smov [#allocation3]   ;;  %s2474_s13 = scalar_lea.hbm %s3279_s3, 2304 }
   0x2   :  { %s27_s10 = sshll.u32 %s2522_s30, 4  ;;  %p2475_p0 = scmp.ne.s32.totalorder %s3279_s3, %s2474_s13  ;;  %s28_s10 = int_to_ptr.vmem [resolvable:$true] %s27_s10 }
   0x3   :  { %p2478_p1 = scmp.lt.u32.totalorder %s2474_s13, %s3279_s3 }
   0x5   :  { %p2480_p2 = pnand %p2478_p1, %p2475_p0 }
   0x7   :  { %2483 = shalt.err (!%p2480_p2)
}
   0x8   :  { %s2484_s18 = scalar_lea.vmem %s28_s10, 2304  ;;  %p2489_p4 = scmp.lt.s32.totalorder %s28_s10, %s28_s10 }
   0x9   :  { %p2485_p3 = scmp.ne.s32.totalorder %s28_s10, %s2484_s18  ;;  %p2490_p5 = scmp.lt.s32.totalorder %s2484_s18, %s2484_s18 }
   0xb   :  { %p2491_p6 = por %p2490_p5, %p2489_p4 }
   0xd   :  { %p2492_p7 = pnand %p2491_p6, %p2485_p3 }
   0xf   :  { %2495 = shalt.err (!%p2492_p7)
}
  0x10   :  { %s2523_s19 = smov 192   ;;  %s2524_s20 = smov 12  }
  0x11   :  { %33 = dma.hbm_to_vmem [thread:$0]  %s3279_s3, 2304, %s28_s10, [#allocation4], %s2523_s19, %s2523_s19, %s2524_s20  }
  0x12   :  { %2518 = dma.done.wait [#allocation4], 2304  }
  0x13   :  { %2519 = vsyncadd [#allocation4], 4294964992  ;;  %v2525_v0 = vmov 0   ;;  %v2596_v1 = vld [vmem:[#allocation3 + $0x4] ss:$12 sps:$4 sm:$0xff]   ;;  %v49_v10 = vld [vmem:[%s3276_s0 + $0x8] sm:$0xff]  ;;  %v188_v21 = vlaneseq }
  0x14   :  { %299 = vmatprep.mubr.bf16.mxu1 %v2525_v0  ;;  %v2598_v2 = vld [vmem:[#allocation3] ss:$12 sps:$4 sm:$0xff]   ;;  %267 = vmatprep.subr.bf16.mxu1 %v2596_v1  ;;  %v2601_v3 = vld [vmem:[#allocation3 + $0x1c] ss:$12 sps:$4 sm:$0xff]   ;;  %v2604_v4 = vld [vmem:[#allocation3 + $0x18] ss:$12 sps:$4 sm:$0xff]  }
  0x15   :  { %268 = vmatpush1.bf16.msra.mxu1 %v2598_v2  ;;  %v2607_v5 = vld [vmem:[#allocation3 + $0x34] ss:$12 sps:$4 sm:$0xff]   ;;  %v2613_v7 = vld [vmem:[#allocation3 + $0x30] ss:$12 sps:$4 sm:$0xff]   ;;  %v2615_v8 = vld [vmem:[#allocation3 + $0x4c] ss:$12 sps:$4 sm:$0xff]  }
  0x16   :  { %269 = vmatprep.subr.bf16.mxu1 %v2601_v3  ;;  %v2240_v6 = vld [vmem:[%s3277_s1] sm:$0xff]   ;;  %vm75_vm0 = vcmask 130048   ;;  %v50_v11 = vld [vmem:[%s3276_s0 + $0x10] sm:$0xff]  ;;  %v51_v12 = vld [vmem:[%s3276_s0 + $0x18] sm:$0xff]  ;;  %v2526_v20 = vmov 0.0|0.0   ;;  %v2679_v26 = vshrl.u32 %v188_v21, 7 }
  0x17   :  { %v48_v9 = vld [vmem:[%s3276_s0] sm:$0xff]  ;;  %2051 = vmatprep.subr.bf16.mxu0 %v2240_v6  ;;  %v2630_v13 = vld [vmem:[#allocation3 + $0x48] ss:$12 sps:$4 sm:$0xff]   ;;  %v57_v15 = vpack.c.bf16 %v51_v12, %v50_v11  ;;  %v55_v52 = vld [vmem:[%s3276_s0 + $0x38] sm:$0xff]  ;;  %s2528_s22 = smov 64   ;;  %vm337_vm1 = vcmask 261120  }
  0x18   :  { %2052 = vmatpush3.bf16.msra.mxu0 %v2240_v6  ;;  %v56_v14 = vpack.c.bf16 %v49_v10, %v48_v9  ;;  %v2632_v16 = vld [vmem:[#allocation3 + $0x64] ss:$12 sps:$4 sm:$0xff]   ;;  %v2639_v17 = vld [vmem:[#allocation3 + $0x60] ss:$12 sps:$4 sm:$0xff]   ;;  %v2642_v18 = vld [vmem:[#allocation3 + $0x7c] ss:$12 sps:$4 sm:$0xff]  }
  0x19   :  { %270 = vmatpush1.bf16.msra.mxu1 %v2604_v4  ;;  %345 = vmatprep.subr.bf16.mxu0 %v2596_v1  ;;  %v2647_v19 = vld [vmem:[#allocation3 + $0x78] ss:$12 sps:$4 sm:$0xff]   ;;  %v190_v27 = vsub.s32 0, %v2679_v26  ;;  %v2685_v28 = vld [vmem:[%s3280_s4] sm:$0x7]  ;;  %s2527_s4 = smov 32  }
  0x1a   :  { %271 = vmatprep.subr.bf16.mxu1 %v2607_v5  ;;  %2053 = vmatprep.mubr.msk.bf16.mxu0 %vm75_vm0, %v56_v14  ;;  %v2690_v29 = vld [vmem:[%s3278_s2] ss:$0 sm:$0xff]  ;;  %v53_v49 = vld [vmem:[%s3276_s0 + $0x28] sm:$0xff]  ;;  %v54_v50 = vld [vmem:[%s3276_s0 + $0x30] sm:$0xff]  ;;  %vm339_vm2 = vcmask 523264   ;;  %vm263_vm3 = vcmask 785408  }
  0x1b   :  { %2054 = vmatmul.mubr.msk.bf16.vlgmr.msra.gmra.mrb[0].mxu0 %vm75_vm0, %v57_v15  ;;  %v2693_v30 = vrot.slane %v2685_v28, %v190_v27  ;;  %v52_v48 = vld [vmem:[%s3276_s0 + $0x20] sm:$0xff]  ;;  %v59_v53 = vpack.c.bf16 %v55_v52, %v54_v50  ;;  %v194_v9 = vsub.s32 1, %v2679_v26  ;;  %v2529_v52 = vmov 0.0   ;;  %s2531_s0 = smov 96  }
  0x1c   :  { %346 = vmatpush1.bf16.msra.mxu0 %v2598_v2  ;;  %v58_v51 = vpack.c.bf16 %v53_v49, %v52_v48  ;;  %vm2530_vm4 = vmmov 0  }
  0x1d   :  { %272 = vmatpush1.bf16.msra.mxu1 %v2613_v7  ;;  %347 = vmatprep.subr.bf16.mxu0 %v2601_v3  ;;  %v2732_v10 = vrot.slane %v2685_v28, %v194_v9 }
  0x1e   :  { %273 = vmatprep.subr.bf16.mxu1 %v2615_v8  ;;  %2057 = vmatprep.mubr.msk.bf16.mxu0 %vm75_vm0, %v58_v51  ;;  %v2748_v51 = vld [vmem:[#allocation3 + $0x8] ss:$12 sps:$4 sm:$0xff]  }
  0x20   :  { %348 = vmatpush1.bf16.msra.mxu0 %v2604_v4 }
  0x21   :  { %274 = vmatpush1.bf16.msra.mxu1 %v2630_v13  ;;  %349 = vmatprep.subr.bf16.mxu0 %v2607_v5 }
  0x22   :  { %275 = vmatprep.subr.bf16.mxu1 %v2632_v16 }
  0x23   :  { %2058 = vmatmul.mubr.msk.bf16.gmra.mrb[4].mxu0 %vm75_vm0, %v59_v53  ;;  %v2752_v53 = vld [vmem:[#allocation3 + $0x20] ss:$12 sps:$4 sm:$0xff]  }
  0x24   :  { %350 = vmatpush1.bf16.msra.mxu0 %v2613_v7  ;;  %377 = vmatprep.mubr.bf16.mxu0 %v2525_v0 }
  0x25   :  { %276 = vmatpush1.bf16.msra.mxu1 %v2639_v17  ;;  %351 = vmatprep.subr.bf16.mxu0 %v2615_v8 }
  0x26   :  { %277 = vmatprep.subr.bf16.mxu1 %v2642_v18 }
  0x28   :  { %352 = vmatpush1.bf16.msra.mxu0 %v2630_v13 }
  0x29   :  { %278 = vmatpush1.bf16.msra.mxu1 %v2647_v19  ;;  %353 = vmatprep.subr.bf16.mxu0 %v2632_v16 }
  0x2a   :  { %486 = vmatprep.subr.bf16.mxu1 %v2596_v1 }
  0x2c   :  { %300 = vmatmul.mubr.bf16.vlgmr.msra.gmra.mrb[0].mxu1 %v2526_v20  ;;  %354 = vmatpush1.bf16.msra.mxu0 %v2639_v17 }
  0x2d   :  { %487 = vmatpush1.bf16.msra.mxu1 %v2598_v2  ;;  %518 = vmatprep.mubr.bf16.mxu1 %v2525_v0 }
  0x2e   :  { %488 = vmatprep.subr.bf16.mxu1 %v2601_v3  ;;  %355 = vmatprep.subr.bf16.mxu0 %v2642_v18 }
  0x30   :  { %356 = vmatpush1.bf16.msra.mxu0 %v2647_v19 }
  0x31   :  { %489 = vmatpush1.bf16.msra.mxu1 %v2604_v4  ;;  %2061 = vmatprep.subr.bf16.mxu0 %v2529_v52 }
  0x32   :  { %490 = vmatprep.subr.bf16.mxu1 %v2607_v5 }
  0x35   :  { %491 = vmatpush1.bf16.msra.mxu1 %v2613_v7 }
  0x36   :  { %492 = vmatprep.subr.bf16.mxu1 %v2615_v8 }
  0x39   :  { %493 = vmatpush1.bf16.msra.mxu1 %v2630_v13 }
  0x3a   :  { %494 = vmatprep.subr.bf16.mxu1 %v2632_v16 }
  0x3d   :  { %495 = vmatpush1.bf16.msra.mxu1 %v2639_v17 }
  0x3e   :  { %496 = vmatprep.subr.bf16.mxu1 %v2642_v18 }
  0x41   :  { %497 = vmatpush1.bf16.msra.mxu1 %v2647_v19 }
  0x42   :  { %655 = vmatprep.subr.bf16.mxu1 %v2596_v1 }
  0xee   :  { %v2675_v22 = vpop.f32.mrb[0].mxu0 }
  0xef   :  { %v122_v23 = vpop.f32.mrb[1].mxu0 }
  0xf0   :  { %v2677_v24 = vpop.f32.mrb[2].mxu0  ;;  %v123_v31 = vadd.f32 %v2690_v29, %v122_v23 }
  0xf1   :  { %v125_v25 = vpop.f32.mrb[3].mxu0 }
  0xf2   :  { %v126_v12 = vadd.f32 %v2690_v29, %v125_v25 }
  0xf6   :  { %v2719_v57 = vpop.f32.mrb[4].mxu0 }
  0xf7   :  { %v2721_v58 = vpop.f32.mrb[5].mxu0 }
  0xf8   :  { %v2723_v59 = vpop.f32.mrb[6].mxu0 }
  0xf9   :  { %v2725_v60 = vpop.f32.mrb[7].mxu0 }
  0xff   :  { %v301_v32 = vpop.f32.mrb[0].mxu1 }
 0x100   :  { %v302_v33 = vadd.f32 %v301_v32, %v2693_v30  ;;  %v303_v34 = vpop.f32.mrb[1].mxu1 }
 0x101   :  { %v304_v35 = vpop.f32.mrb[2].mxu1 }
 0x102   :  { %v308_v36 = vadd.f32 %v302_v33, %v123_v31  ;;  %v305_v37 = vpop.f32.mrb[3].mxu1 }
 0x104   :  { %2263 = vtanh.f32 %v308_v36  ;;  %v1919_v39 = vmul.f32 -1.442695, %v308_v36 }
 0x106   :  { %2265 = vpow2.f32 %v1919_v39 }
 0x10e   :  { %v2264_v38 = vpop.eup %2263 }
 0x10f   :  { %318 = vrot.lane.b32.xlu0 %v2264_v38, %s2527_s4 }
 0x110   :  { %v2266_v40 = vpop.eup %2265 }
 0x111   :  { %v312_v41 = vadd.f32 1.0, %v2266_v40 }
 0x113   :  { %2267 = vrcp.f32 %v312_v41 }
 0x11d   :  { %v2268_v42 = vpop.eup %2267 }
 0x11e   :  { %v316_v45 = vmul.f32 0.0, %v2268_v42 }
 0x181   :  { %v319_v43 = vpop.permute.xlu0 %318 }
 0x182   :  { %v321_v44 = vmul.f32 %v2268_v42, %v319_v43 }
 0x184   :  { %323 = vrot.lane.b32.xlu0 %v321_v44, %s2527_s4 }
 0x1f6   :  { %v324_v46 = vpop.permute.xlu0 %323 }
 0x1f7   :  { %v2699_v47 = vadd.f32 %v324_v46, %v316_v45 }
 0x1f9   :  { %2269 = vtanh.f32 %v2699_v47 }
 0x203   :  { %v2270_v54 = vpop.eup %2269 }
 0x204   :  { %329 = vrot.lane.b32.xlu1 %v2270_v54, %s2527_s4 }
 0x276   :  { %v330_v55 = vpop.permute.xlu1 %329 }
 0x277   :  { %v332_v56 = vmul.f32 %v2268_v42, %v330_v55 }
 0x279   :  { %334 = vrot.lane.b32.xlu1 %v332_v56, %s2528_s22  ;;  %v2761_v56 = vld [vmem:[#allocation3 + $0x50] ss:$12 sps:$4 sm:$0xff]  }
 0x2eb   :  { %v335_v61 = vpop.permute.xlu1 %334 }
 0x2ec   :  { %v338_v62 = vsel %vm337_vm1, %v335_v61, 0.0  ;;  %v2766_v61 = vld [vmem:[#allocation3 + $0x68] ss:$12 sps:$4 sm:$0xff]  }
 0x2ed   :  { %v340_v63 = vsel %vm339_vm2, %v338_v62, 0.0  ;;  %v2771_v62 = vld [vmem:[#allocation3 + $0x80] ss:$12 sps:$4 sm:$0xff]  }
 0x2ee   :  { %v341_v6 = vpack.c.bf16 %v340_v63, %v340_v63 }
 0x2f0   :  { %1920 = vmatmul.mubr.msk.bf16.vlgmr.msra.gmra.mrb[8].mxu0 %vm263_vm3, %v341_v6 }
 0x2f1   :  { %2062 = vmatpush3.bf16.msra.mxu0 %v2748_v51  ;;  %2073 = vmatprep.mubr.msk.bf16.mxu0 %vm2530_vm4, %v2529_v52 }
 0x2f2   :  { %2063 = vmatprep.subr.bf16.mxu0 %v2529_v52 }
 0x2f5   :  { %2064 = vmatpush3.bf16.msra.mxu0 %v2752_v53 }
 0x2f6   :  { %2065 = vmatprep.subr.bf16.mxu0 %v2529_v52 }
 0x3c3   :  { %v379_v11 = vpop.f32.mrb[8].mxu0 }
 0x3c4   :  { %v380_v14 = vadd.f32 %v379_v11, %v2693_v30  ;;  %v381_v15 = vpop.f32.mrb[9].mxu0 }
 0x3c5   :  { %v382_v20 = vadd.f32 %v381_v15, %v2732_v10  ;;  %v383_v21 = vpop.f32.mrb[10].mxu0 }
 0x3c6   :  { %v387_v23 = vadd.f32 %v380_v14, %v126_v12  ;;  %v384_v27 = vpop.f32.mrb[11].mxu0 }
 0x3c7   :  { %2271 = vtanh.f32 %v382_v20  ;;  %v1922_v33 = vmul.f32 -1.442695, %v382_v20 }
 0x3c8   :  { %2273 = vtanh.f32 %v387_v23  ;;  %v1921_v34 = vmul.f32 -1.442695, %v387_v23  ;;  %v198_v23 = vsub.s32 2, %v2679_v26 }
 0x3c9   :  { %2275 = vpow2.f32 %v1922_v33 }
 0x3ca   :  { %2277 = vpow2.f32 %v1921_v34  ;;  %v2815_v34 = vrot.slane %v2685_v28, %v198_v23 }
 0x3d1   :  { %v2272_v31 = vpop.eup %2271 }
 0x3d2   :  { %v2274_v32 = vpop.eup %2273  ;;  %421 = vrot.lane.b32.xlu1 %v2272_v31, %s2527_s4 }
 0x3d3   :  { %397 = vrot.lane.b32.xlu0 %v2274_v32, %s2527_s4  ;;  %v2276_v25 = vpop.eup %2275  ;;  %v131_v32 = vadd.f32 %v2675_v22, %v2690_v29 }
 0x3d4   :  { %v2278_v35 = vpop.eup %2277  ;;  %v415_v36 = vadd.f32 1.0, %v2276_v25 }
 0x3d5   :  { %v391_v37 = vadd.f32 1.0, %v2278_v35 }
 0x3d6   :  { %2279 = vrcp.f32 %v415_v36 }
 0x3d7   :  { %2281 = vrcp.f32 %v391_v37 }
 0x3e0   :  { %v2280_v38 = vpop.eup %2279 }
 0x3e1   :  { %v2282_v40 = vpop.eup %2281  ;;  %v419_v44 = vmul.f32 0.0, %v2280_v38 }
 0x3e2   :  { %v395_v46 = vmul.f32 %v2282_v40, %v2699_v47  ;;  %v2756_v47 = vld [vmem:[#allocation3 + $0x38] ss:$12 sps:$4 sm:$0xff]  }
 0x3e3   :  { %2066 = vmatpush3.bf16.msra.mxu0 %v2756_v47 }
 0x3e4   :  { %2067 = vmatprep.subr.bf16.mxu0 %v2529_v52 }
 0x3e7   :  { %2068 = vmatpush3.bf16.msra.mxu0 %v2761_v56 }
 0x3e8   :  { %2069 = vmatprep.subr.bf16.mxu0 %v2529_v52 }
 0x3eb   :  { %2070 = vmatpush3.bf16.msra.mxu0 %v2766_v61 }
 0x3ec   :  { %2071 = vmatprep.subr.bf16.mxu0 %v2529_v52 }
 0x3ef   :  { %2072 = vmatpush3.bf16.msra.mxu0 %v2771_v62 }
 0x3f0   :  { %2077 = vmatprep.subr.bf16.mxu0 %v2529_v52 }
 0x444   :  { %v422_v39 = vpop.permute.xlu1 %421 }
 0x445   :  { %v424_v41 = vmul.f32 %v2280_v38, %v422_v39  ;;  %v398_v42 = vpop.permute.xlu0 %397 }
 0x446   :  { %v400_v43 = vmul.f32 %v2282_v40, %v398_v42 }
 0x447   :  { %426 = vrot.lane.b32.xlu1 %v424_v41, %s2527_s4 }
 0x448   :  { %402 = vrot.lane.b32.xlu0 %v400_v43, %s2527_s4 }
 0x4b9   :  { %v427_v45 = vpop.permute.xlu1 %426 }
 0x4ba   :  { %v2742_v48 = vadd.f32 %v427_v45, %v419_v44  ;;  %v403_v49 = vpop.permute.xlu0 %402 }
 0x4bb   :  { %v2744_v50 = vadd.f32 %v403_v49, %v395_v46 }
 0x4bc   :  { %2283 = vtanh.f32 %v2742_v48 }
 0x4bd   :  { %2285 = vtanh.f32 %v2744_v50 }
 0x4c6   :  { %v2284_v54 = vpop.eup %2283 }
 0x4c7   :  { %v2286_v55 = vpop.eup %2285  ;;  %432 = vrot.lane.b32.xlu1 %v2284_v54, %s2527_s4 }
 0x4c8   :  { %408 = vrot.lane.b32.xlu0 %v2286_v55, %s2527_s4 }
 0x539   :  { %v433_v63 = vpop.permute.xlu1 %432 }
 0x53a   :  { %v435_v6 = vmul.f32 %v2280_v38, %v433_v63  ;;  %v409_v9 = vpop.permute.xlu0 %408 }
 0x53b   :  { %v411_v11 = vmul.f32 %v2282_v40, %v409_v9 }
 0x53c   :  { %441 = vrot.lane.b32.xlu1 %v435_v6, %s2531_s0 }
 0x53d   :  { %437 = vrot.lane.b32.xlu0 %v411_v11, %s2528_s22 }
 0x5ae   :  { %v442_v12 = vpop.permute.xlu1 %441 }
 0x5af   :  { %v438_v14 = vpop.permute.xlu0 %437 }
 0x5b0   :  { %v444_v15 = vsel %vm337_vm1, %v438_v14, %v442_v12 }
 0x5b1   :  { %v445_v20 = vsel %vm339_vm2, %v444_v15, 0.0 }
 0x5b2   :  { %v446_v21 = vpack.c.bf16 %v445_v20, %v445_v20 }
 0x5b4   :  { %1929 = vmatmul.mubr.msk.bf16.vlgmr.msra.gmra.mrb[4].mxu1 %vm263_vm3, %v446_v21  ;;  %2074 = vmatmul.mubr.msk.bf16.vlgmr.msra.gmra.mrb[12].mxu0 %vm263_vm3, %v446_v21 }
 0x5b5   :  { %656 = vmatpush1.bf16.msra.mxu1 %v2598_v2  ;;  %2078 = vmatpush3.bf16.msra.mxu0 %v2748_v51 }
 0x5b6   :  { %657 = vmatprep.subr.bf16.mxu1 %v2601_v3  ;;  %2079 = vmatprep.subr.bf16.mxu0 %v2529_v52 }
 0x5b7   :  { %687 = vmatprep.mubr.bf16.mxu1 %v2525_v0  ;;  %2089 = vmatprep.mubr.msk.bf16.mxu0 %vm2530_vm4, %v2529_v52 }
 0x5b9   :  { %658 = vmatpush1.bf16.msra.mxu1 %v2604_v4  ;;  %2080 = vmatpush3.bf16.msra.mxu0 %v2752_v53 }
 0x5ba   :  { %659 = vmatprep.subr.bf16.mxu1 %v2607_v5  ;;  %2081 = vmatprep.subr.bf16.mxu0 %v2529_v52 }
 0x5bd   :  { %660 = vmatpush1.bf16.msra.mxu1 %v2613_v7  ;;  %2082 = vmatpush3.bf16.msra.mxu0 %v2756_v47 }
 0x5be   :  { %661 = vmatprep.subr.bf16.mxu1 %v2615_v8  ;;  %2083 = vmatprep.subr.bf16.mxu0 %v2529_v52 }
 0x5c1   :  { %662 = vmatpush1.bf16.msra.mxu1 %v2630_v13  ;;  %2084 = vmatpush3.bf16.msra.mxu0 %v2761_v56 }
 0x5c2   :  { %663 = vmatprep.subr.bf16.mxu1 %v2632_v16  ;;  %2085 = vmatprep.subr.bf16.mxu0 %v2529_v52 }
 0x5c5   :  { %664 = vmatpush1.bf16.msra.mxu1 %v2639_v17  ;;  %2086 = vmatpush3.bf16.msra.mxu0 %v2766_v61 }
 0x5c6   :  { %665 = vmatprep.subr.bf16.mxu1 %v2642_v18  ;;  %2087 = vmatprep.subr.bf16.mxu0 %v2529_v52 }
 0x5c9   :  { %666 = vmatpush1.bf16.msra.mxu1 %v2647_v19  ;;  %2088 = vmatpush3.bf16.msra.mxu0 %v2771_v62 }
 0x5ca   :  { %824 = vmatprep.subr.bf16.mxu1 %v2596_v1  ;;  %2093 = vmatprep.subr.bf16.mxu0 %v2529_v52 }
 0x687   :  { %v520_v27 = vpop.f32.mrb[4].mxu1  ;;  %v561_v31 = vpop.f32.mrb[12].mxu0 }
 0x688   :  { %v521_v33 = vadd.f32 %v520_v27, %v2693_v30  ;;  %v522_v25 = vpop.f32.mrb[5].mxu1  ;;  %v2075_v35 = vpop.f32.mrb[13].mxu0  ;;  %v562_v26 = vadd.f32 %v561_v31, %v2815_v34 }
 0x689   :  { %v523_v36 = vadd.f32 %v522_v25, %v2732_v10  ;;  %v524_v37 = vpop.f32.mrb[6].mxu1  ;;  %v564_v38 = vpop.f32.mrb[14].mxu0 }
 0x68a   :  { %v568_v39 = vadd.f32 %v521_v33, %v131_v32  ;;  %v525_v40 = vpop.f32.mrb[7].mxu1  ;;  %v2076_v41 = vpop.f32.mrb[15].mxu0  ;;  %v1933_v45 = vmul.f32 -1.442695, %v562_v26 }
 0x68b   :  { %2287 = vtanh.f32 %v523_v36  ;;  %v1932_v43 = vmul.f32 -1.442695, %v523_v36 }
 0x68c   :  { %2289 = vtanh.f32 %v568_v39  ;;  %v1931_v44 = vmul.f32 -1.442695, %v568_v39 }
 0x68d   :  { %2291 = vtanh.f32 %v562_v26 }
 0x68e   :  { %2293 = vpow2.f32 %v1932_v43 }
 0x68f   :  { %2295 = vpow2.f32 %v1931_v44 }
 0x690   :  { %2297 = vpow2.f32 %v1933_v45 }
 0x695   :  { %v2288_v22 = vpop.eup %2287 }
 0x696   :  { %v2290_v42 = vpop.eup %2289  ;;  %602 = vrot.lane.b32.xlu1 %v2288_v22, %s2527_s4 }
 0x697   :  { %578 = vrot.lane.b32.xlu0 %v2290_v42, %s2527_s4  ;;  %v2292_v28 = vpop.eup %2291 }
 0x698   :  { %v2294_v46 = vpop.eup %2293 }
 0x699   :  { %v2296_v49 = vpop.eup %2295  ;;  %v596_v54 = vadd.f32 1.0, %v2294_v46 }
 0x69a   :  { %v572_v55 = vadd.f32 1.0, %v2296_v49  ;;  %v2298_v63 = vpop.eup %2297 }
 0x69b   :  { %626 = vrot.lane.b32.xlu0 %v2292_v28, %s2527_s4  ;;  %2299 = vrcp.f32 %v596_v54  ;;  %v620_v6 = vadd.f32 1.0, %v2298_v63 }
 0x69c   :  { %2301 = vrcp.f32 %v572_v55 }
 0x69d   :  { %2303 = vrcp.f32 %v620_v6  ;;  %v134_v6 = vadd.f32 %v2677_v24, %v2690_v29 }
 0x6a5   :  { %v2300_v9 = vpop.eup %2299 }
 0x6a6   :  { %v2302_v12 = vpop.eup %2301  ;;  %v600_v31 = vmul.f32 %v2300_v9, %v2742_v48 }
 0x6a7   :  { %v2304_v21 = vpop.eup %2303  ;;  %v576_v33 = vmul.f32 %v2302_v12, %v2744_v50 }
 0x6a8   :  { %v624_v37 = vmul.f32 0.0, %v2304_v21 }
 0x708   :  { %v603_v11 = vpop.permute.xlu1 %602 }
 0x709   :  { %v605_v14 = vmul.f32 %v2300_v9, %v603_v11  ;;  %v579_v15 = vpop.permute.xlu0 %578 }
 0x70a   :  { %v581_v20 = vmul.f32 %v2302_v12, %v579_v15 }
 0x70b   :  { %607 = vrot.lane.b32.xlu0 %v605_v14, %s2527_s4 }
 0x70c   :  { %583 = vrot.lane.b32.xlu1 %v581_v20, %s2527_s4 }
 0x70d   :  { %v627_v23 = vpop.permute.xlu0 %626 }
 0x70e   :  { %v629_v27 = vmul.f32 %v2304_v21, %v627_v23 }
 0x710   :  { %631 = vrot.lane.b32.xlu1 %v629_v27, %s2527_s4 }
 0x77d   :  { %v608_v32 = vpop.permute.xlu0 %607 }
 0x77e   :  { %v2827_v25 = vadd.f32 %v608_v32, %v600_v31  ;;  %v584_v35 = vpop.permute.xlu1 %583 }
 0x77f   :  { %v2829_v36 = vadd.f32 %v584_v35, %v576_v33 }
 0x780   :  { %2305 = vtanh.f32 %v2827_v25 }
 0x781   :  { %2307 = vtanh.f32 %v2829_v36 }
 0x782   :  { %v632_v38 = vpop.permute.xlu1 %631 }
 0x783   :  { %v2833_v39 = vadd.f32 %v632_v38, %v624_v37 }
 0x785   :  { %2309 = vtanh.f32 %v2833_v39 }
 0x78a   :  { %v2306_v40 = vpop.eup %2305 }
 0x78b   :  { %v2308_v48 = vpop.eup %2307  ;;  %613 = vrot.lane.b32.xlu1 %v2306_v40, %s2527_s4 }
 0x78c   :  { %589 = vrot.lane.b32.xlu0 %v2308_v48, %s2527_s4 }
 0x78f   :  { %v2310_v50 = vpop.eup %2309 }
 0x790   :  { %637 = vrot.lane.b32.xlu0 %v2310_v50, %s2527_s4 }
 0x7fd   :  { %v614_v41 = vpop.permute.xlu1 %613 }
 0x7fe   :  { %v616_v26 = vmul.f32 %v2300_v9, %v614_v41  ;;  %v590_v22 = vpop.permute.xlu0 %589 }
 0x7ff   :  { %v592_v42 = vmul.f32 %v2302_v12, %v590_v22 }
 0x800   :  { %646 = vrot.lane.b32.xlu0 %v616_v26, %s2531_s0 }
 0x801   :  { %642 = vrot.lane.b32.xlu1 %v592_v42, %s2528_s22 }
 0x802   :  { %v638_v28 = vpop.permute.xlu0 %637 }
 0x803   :  { %v640_v44 = vmul.f32 %v2304_v21, %v638_v28 }
 0x872   :  { %v647_v43 = vpop.permute.xlu0 %646 }
 0x873   :  { %v643_v45 = vpop.permute.xlu1 %642 }
 0x874   :  { %v649_v46 = vsel %vm337_vm1, %v643_v45, %v647_v43 }
 0x875   :  { %v650_v49 = vsel %vm339_vm2, %v649_v46, %v640_v44 }
 0x876   :  { %v651_v54 = vpack.c.bf16 %v650_v49, %v650_v49 }
 0x878   :  { %1934 = vmatmul.mubr.msk.bf16.vlgmr.msra.gmra.mrb[8].mxu1 %vm263_vm3, %v651_v54  ;;  %2090 = vmatmul.mubr.msk.bf16.vlgmr.msra.gmra.mrb[16].mxu0 %vm263_vm3, %v651_v54 }
 0x879   :  { %825 = vmatpush1.bf16.msra.mxu1 %v2598_v2  ;;  %2094 = vmatpush3.bf16.msra.mxu0 %v2748_v51 }
 0x87a   :  { %826 = vmatprep.subr.bf16.mxu1 %v2601_v3  ;;  %2095 = vmatprep.subr.bf16.mxu0 %v2529_v52 }
 0x87b   :  { %856 = vmatprep.mubr.bf16.mxu1 %v2525_v0  ;;  %2105 = vmatprep.mubr.msk.bf16.mxu0 %vm2530_vm4, %v2529_v52 }
 0x87d   :  { %827 = vmatpush1.bf16.msra.mxu1 %v2604_v4  ;;  %2096 = vmatpush3.bf16.msra.mxu0 %v2752_v53 }
 0x87e   :  { %828 = vmatprep.subr.bf16.mxu1 %v2607_v5  ;;  %2097 = vmatprep.subr.bf16.mxu0 %v2529_v52 }
 0x881   :  { %829 = vmatpush1.bf16.msra.mxu1 %v2613_v7  ;;  %2098 = vmatpush3.bf16.msra.mxu0 %v2756_v47 }
 0x882   :  { %830 = vmatprep.subr.bf16.mxu1 %v2615_v8  ;;  %2099 = vmatprep.subr.bf16.mxu0 %v2529_v52 }
 0x885   :  { %831 = vmatpush1.bf16.msra.mxu1 %v2630_v13  ;;  %2100 = vmatpush3.bf16.msra.mxu0 %v2761_v56 }
 0x886   :  { %832 = vmatprep.subr.bf16.mxu1 %v2632_v16  ;;  %2101 = vmatprep.subr.bf16.mxu0 %v2529_v52 }
 0x889   :  { %833 = vmatpush1.bf16.msra.mxu1 %v2639_v17  ;;  %2102 = vmatpush3.bf16.msra.mxu0 %v2766_v61 }
 0x88a   :  { %834 = vmatprep.subr.bf16.mxu1 %v2642_v18  ;;  %2103 = vmatprep.subr.bf16.mxu0 %v2529_v52 }
 0x88d   :  { %835 = vmatpush1.bf16.msra.mxu1 %v2647_v19  ;;  %2104 = vmatpush3.bf16.msra.mxu0 %v2771_v62 }
 0x88e   :  { %993 = vmatprep.subr.bf16.mxu1 %v2596_v1  ;;  %2109 = vmatprep.subr.bf16.mxu0 %v2529_v52 }
 0x94b   :  { %v689_v55 = vpop.f32.mrb[8].mxu1  ;;  %v730_v63 = vpop.f32.mrb[16].mxu0 }
 0x94c   :  { %v690_v9 = vadd.f32 %v689_v55, %v2693_v30  ;;  %v691_v11 = vpop.f32.mrb[9].mxu1  ;;  %v2091_v12 = vpop.f32.mrb[17].mxu0  ;;  %v731_v31 = vadd.f32 %v730_v63, %v2815_v34 }
 0x94d   :  { %v692_v14 = vadd.f32 %v691_v11, %v2732_v10  ;;  %v693_v15 = vpop.f32.mrb[10].mxu1  ;;  %v733_v20 = vpop.f32.mrb[18].mxu0 }
 0x94e   :  { %v737_v21 = vadd.f32 %v690_v9, %v134_v6  ;;  %v694_v23 = vpop.f32.mrb[11].mxu1  ;;  %v2092_v27 = vpop.f32.mrb[19].mxu0  ;;  %v1938_v38 = vmul.f32 -1.442695, %v731_v31 }
 0x94f   :  { %2311 = vtanh.f32 %v692_v14  ;;  %v1937_v35 = vmul.f32 -1.442695, %v692_v14 }
 0x950   :  { %2313 = vtanh.f32 %v737_v21  ;;  %v1936_v37 = vmul.f32 -1.442695, %v737_v21 }
 0x951   :  { %2315 = vtanh.f32 %v731_v31 }
 0x952   :  { %2317 = vpow2.f32 %v1937_v35 }
 0x953   :  { %2319 = vpow2.f32 %v1936_v37 }
 0x954   :  { %2321 = vpow2.f32 %v1938_v38 }
 0x959   :  { %v2312_v32 = vpop.eup %2311 }
 0x95a   :  { %v2314_v33 = vpop.eup %2313  ;;  %771 = vrot.lane.b32.xlu0 %v2312_v32, %s2527_s4 }
 0x95b   :  { %747 = vrot.lane.b32.xlu1 %v2314_v33, %s2527_s4  ;;  %v2316_v24 = vpop.eup %2315 }
 0x95c   :  { %v2318_v40 = vpop.eup %2317 }
 0x95d   :  { %v2320_v48 = vpop.eup %2319  ;;  %v765_v50 = vadd.f32 1.0, %v2318_v40 }
 0x95e   :  { %v741_v41 = vadd.f32 1.0, %v2320_v48  ;;  %v2322_v26 = vpop.eup %2321 }
 0x95f   :  { %795 = vrot.lane.b32.xlu1 %v2316_v24, %s2527_s4  ;;  %2323 = vrcp.f32 %v765_v50  ;;  %v789_v22 = vadd.f32 1.0, %v2322_v26 }
 0x960   :  { %2325 = vrcp.f32 %v741_v41 }
 0x961   :  { %2327 = vrcp.f32 %v789_v22 }
 0x969   :  { %v2324_v42 = vpop.eup %2323 }
 0x96a   :  { %v2326_v43 = vpop.eup %2325  ;;  %v769_v63 = vmul.f32 %v2324_v42, %v2827_v25 }
 0x96b   :  { %v2328_v49 = vpop.eup %2327  ;;  %v745_v9 = vmul.f32 %v2326_v43, %v2829_v36 }
 0x96c   :  { %v793_v15 = vmul.f32 %v2328_v49, %v2833_v39 }
 0x9cc   :  { %v772_v28 = vpop.permute.xlu0 %771 }
 0x9cd   :  { %v774_v44 = vmul.f32 %v2324_v42, %v772_v28  ;;  %v748_v45 = vpop.permute.xlu1 %747 }
 0x9ce   :  { %v750_v46 = vmul.f32 %v2326_v43, %v748_v45 }
 0x9cf   :  { %776 = vrot.lane.b32.xlu1 %v774_v44, %s2527_s4 }
 0x9d0   :  { %752 = vrot.lane.b32.xlu0 %v750_v46, %s2527_s4 }
 0x9d1   :  { %v796_v54 = vpop.permute.xlu1 %795 }
 0x9d2   :  { %v798_v55 = vmul.f32 %v2328_v49, %v796_v54 }
 0x9d4   :  { %800 = vrot.lane.b32.xlu0 %v798_v55, %s2527_s4 }
 0xa41   :  { %v777_v6 = vpop.permute.xlu1 %776 }
 0xa42   :  { %v2885_v11 = vadd.f32 %v777_v6, %v769_v63  ;;  %v753_v12 = vpop.permute.xlu0 %752 }
 0xa43   :  { %v2887_v14 = vadd.f32 %v753_v12, %v745_v9 }
 0xa44   :  { %2329 = vtanh.f32 %v2885_v11 }
 0xa45   :  { %2331 = vtanh.f32 %v2887_v14 }
 0xa46   :  { %v801_v20 = vpop.permute.xlu0 %800 }
 0xa47   :  { %v2892_v21 = vadd.f32 %v801_v20, %v793_v15 }
 0xa49   :  { %2333 = vtanh.f32 %v2892_v21 }
 0xa4e   :  { %v2330_v25 = vpop.eup %2329 }
 0xa4f   :  { %v2332_v23 = vpop.eup %2331  ;;  %782 = vrot.lane.b32.xlu0 %v2330_v25, %s2527_s4 }
 0xa50   :  { %758 = vrot.lane.b32.xlu1 %v2332_v23, %s2527_s4 }
 0xa53   :  { %v2334_v36 = vpop.eup %2333 }
 0xa54   :  { %806 = vrot.lane.b32.xlu1 %v2334_v36, %s2527_s4 }
 0xac1   :  { %v783_v27 = vpop.permute.xlu0 %782 }
 0xac2   :  { %v785_v31 = vmul.f32 %v2324_v42, %v783_v27  ;;  %v759_v32 = vpop.permute.xlu1 %758 }
 0xac3   :  { %v761_v33 = vmul.f32 %v2326_v43, %v759_v32 }
 0xac4   :  { %815 = vrot.lane.b32.xlu1 %v785_v31, %s2531_s0 }
 0xac5   :  { %811 = vrot.lane.b32.xlu0 %v761_v33, %s2528_s22 }
 0xac6   :  { %v807_v39 = vpop.permute.xlu1 %806 }
 0xac7   :  { %v809_v35 = vmul.f32 %v2328_v49, %v807_v39 }
 0xb36   :  { %v816_v24 = vpop.permute.xlu1 %815 }
 0xb37   :  { %v812_v37 = vpop.permute.xlu0 %811 }
 0xb38   :  { %v818_v38 = vsel %vm337_vm1, %v812_v37, %v816_v24 }
 0xb39   :  { %v819_v40 = vsel %vm339_vm2, %v818_v38, %v809_v35 }
 0xb3a   :  { %v820_v48 = vpack.c.bf16 %v819_v40, %v819_v40 }
 0xb3c   :  { %1939 = vmatmul.mubr.msk.bf16.vlgmr.msra.gmra.mrb[12].mxu1 %vm263_vm3, %v820_v48  ;;  %2106 = vmatmul.mubr.msk.bf16.vlgmr.msra.gmra.mrb[20].mxu0 %vm263_vm3, %v820_v48 }
 0xb3d   :  { %994 = vmatpush1.bf16.msra.mxu1 %v2598_v2  ;;  %2110 = vmatpush3.bf16.msra.mxu0 %v2748_v51 }
 0xb3e   :  { %995 = vmatprep.subr.bf16.mxu1 %v2601_v3  ;;  %2111 = vmatprep.subr.bf16.mxu0 %v2529_v52 }
 0xb3f   :  { %1025 = vmatprep.mubr.bf16.mxu1 %v2525_v0  ;;  %2121 = vmatprep.mubr.msk.bf16.mxu0 %vm2530_vm4, %v2529_v52 }
 0xb41   :  { %996 = vmatpush1.bf16.msra.mxu1 %v2604_v4  ;;  %2112 = vmatpush3.bf16.msra.mxu0 %v2752_v53  ;;  %v139_v4 = vadd.f32 %v2690_v29, %v2721_v58 }
 0xb42   :  { %997 = vmatprep.subr.bf16.mxu1 %v2607_v5  ;;  %2113 = vmatprep.subr.bf16.mxu0 %v2529_v52 }
 0xb45   :  { %998 = vmatpush1.bf16.msra.mxu1 %v2613_v7  ;;  %2114 = vmatpush3.bf16.msra.mxu0 %v2756_v47 }
 0xb46   :  { %999 = vmatprep.subr.bf16.mxu1 %v2615_v8  ;;  %2115 = vmatprep.subr.bf16.mxu0 %v2529_v52 }
 0xb49   :  { %1000 = vmatpush1.bf16.msra.mxu1 %v2630_v13  ;;  %2116 = vmatpush3.bf16.msra.mxu0 %v2761_v56 }
 0xb4a   :  { %1001 = vmatprep.subr.bf16.mxu1 %v2632_v16  ;;  %2117 = vmatprep.subr.bf16.mxu0 %v2529_v52 }
 0xb4d   :  { %1002 = vmatpush1.bf16.msra.mxu1 %v2639_v17  ;;  %2118 = vmatpush3.bf16.msra.mxu0 %v2766_v61 }
 0xb4e   :  { %1003 = vmatprep.subr.bf16.mxu1 %v2642_v18  ;;  %2119 = vmatprep.subr.bf16.mxu0 %v2529_v52 }
 0xb51   :  { %1004 = vmatpush1.bf16.msra.mxu1 %v2647_v19  ;;  %2120 = vmatpush3.bf16.msra.mxu0 %v2771_v62 }
 0xb52   :  { %1162 = vmatprep.subr.bf16.mxu1 %v2596_v1  ;;  %2125 = vmatprep.subr.bf16.mxu0 %v2529_v52 }
 0xc0f   :  { %v858_v2 = vpop.f32.mrb[12].mxu1  ;;  %v899_v3 = vpop.f32.mrb[20].mxu0 }
 0xc10   :  { %v859_v5 = vadd.f32 %v858_v2, %v2693_v30  ;;  %v860_v7 = vpop.f32.mrb[13].mxu1  ;;  %v2107_v8 = vpop.f32.mrb[21].mxu0  ;;  %v900_v1 = vadd.f32 %v899_v3, %v2815_v34 }
 0xc11   :  { %v861_v13 = vadd.f32 %v860_v7, %v2732_v10  ;;  %v862_v16 = vpop.f32.mrb[14].mxu1  ;;  %v902_v17 = vpop.f32.mrb[22].mxu0 }
 0xc12   :  { %v906_v18 = vadd.f32 %v859_v5, %v139_v4  ;;  %v863_v19 = vpop.f32.mrb[15].mxu1  ;;  %v2108_v50 = vpop.f32.mrb[23].mxu0  ;;  %v1943_v28 = vmul.f32 -1.442695, %v900_v1  ;;  %v2963_v17 = vld [vmem:[#allocation3] ss:$12 sps:$4 sm:$0xff]  }
 0xc13   :  { %2335 = vtanh.f32 %v861_v13  ;;  %v1942_v22 = vmul.f32 -1.442695, %v861_v13  ;;  %v2974_v19 = vld [vmem:[#allocation3 + $0x18] ss:$12 sps:$4 sm:$0xff]   ;;  %v2978_v50 = vld [vmem:[#allocation3 + $0x34] ss:$12 sps:$4 sm:$0xff]  }
 0xc14   :  { %2337 = vtanh.f32 %v906_v18  ;;  %v1941_v42 = vmul.f32 -1.442695, %v906_v18  ;;  %v2967_v18 = vld [vmem:[#allocation3 + $0x1c] ss:$12 sps:$4 sm:$0xff]  }
 0xc15   :  { %2339 = vtanh.f32 %v900_v1  ;;  %v2982_v1 = vld [vmem:[#allocation3 + $0x30] ss:$12 sps:$4 sm:$0xff]  }
 0xc16   :  { %2341 = vpow2.f32 %v1942_v22  ;;  %v2998_v22 = vld [vmem:[#allocation3 + $0x60] ss:$12 sps:$4 sm:$0xff]  }
 0xc17   :  { %2343 = vpow2.f32 %v1941_v42  ;;  %v3002_v42 = vld [vmem:[#allocation3 + $0x7c] ss:$12 sps:$4 sm:$0xff]  }
 0xc18   :  { %2345 = vpow2.f32 %v1943_v28  ;;  %v3006_v28 = vld [vmem:[#allocation3 + $0x78] ss:$12 sps:$4 sm:$0xff]  }
 0xc1d   :  { %v2336_v41 = vpop.eup %2335 }
 0xc1e   :  { %v2338_v26 = vpop.eup %2337  ;;  %940 = vrot.lane.b32.xlu1 %v2336_v41, %s2527_s4  ;;  %v2986_v41 = vld [vmem:[#allocation3 + $0x4c] ss:$12 sps:$4 sm:$0xff]  }
 0xc1f   :  { %916 = vrot.lane.b32.xlu0 %v2338_v26, %s2527_s4  ;;  %v2340_v58 = vpop.eup %2339  ;;  %v2990_v26 = vld [vmem:[#allocation3 + $0x48] ss:$12 sps:$4 sm:$0xff]  }
 0xc20   :  { %v2342_v43 = vpop.eup %2341 }
 0xc21   :  { %v2344_v44 = vpop.eup %2343  ;;  %v934_v45 = vadd.f32 1.0, %v2342_v43  ;;  %v3010_v43 = vld [vmem:[#allocation3 + $0x4] ss:$12 sps:$4 sm:$0xff]  }
 0xc22   :  { %v910_v46 = vadd.f32 1.0, %v2344_v44  ;;  %v2346_v49 = vpop.eup %2345 }
 0xc23   :  { %964 = vrot.lane.b32.xlu0 %v2340_v58, %s2527_s4  ;;  %2347 = vrcp.f32 %v934_v45  ;;  %v958_v54 = vadd.f32 1.0, %v2346_v49  ;;  %v2994_v58 = vld [vmem:[#allocation3 + $0x64] ss:$12 sps:$4 sm:$0xff]  }
 0xc24   :  { %2349 = vrcp.f32 %v910_v46  ;;  %v142_v46 = vadd.f32 %v2690_v29, %v2725_v60 }
 0xc25   :  { %2351 = vrcp.f32 %v958_v54 }
 0xc2d   :  { %v2348_v55 = vpop.eup %2347 }
 0xc2e   :  { %v2350_v6 = vpop.eup %2349  ;;  %v938_v36 = vmul.f32 %v2348_v55, %v2885_v11 }
 0xc2f   :  { %v2352_v20 = vpop.eup %2351  ;;  %v914_v31 = vmul.f32 %v2350_v6, %v2887_v14 }
 0xc30   :  { %v962_v24 = vmul.f32 %v2352_v20, %v2892_v21 }
 0xc90   :  { %v941_v63 = vpop.permute.xlu1 %940 }
 0xc91   :  { %v943_v9 = vmul.f32 %v2348_v55, %v941_v63  ;;  %v917_v12 = vpop.permute.xlu0 %916 }
 0xc92   :  { %v919_v15 = vmul.f32 %v2350_v6, %v917_v12 }
 0xc93   :  { %945 = vrot.lane.b32.xlu0 %v943_v9, %s2527_s4 }
 0xc94   :  { %921 = vrot.lane.b32.xlu1 %v919_v15, %s2527_s4 }
 0xc95   :  { %v965_v25 = vpop.permute.xlu0 %964 }
 0xc96   :  { %v967_v23 = vmul.f32 %v2352_v20, %v965_v25 }
 0xc98   :  { %969 = vrot.lane.b32.xlu1 %v967_v23, %s2527_s4 }
 0xd05   :  { %v946_v27 = vpop.permute.xlu0 %945 }
 0xd06   :  { %v2944_v32 = vadd.f32 %v946_v27, %v938_v36  ;;  %v922_v33 = vpop.permute.xlu1 %921 }
 0xd07   :  { %v2946_v39 = vadd.f32 %v922_v33, %v914_v31 }
 0xd08   :  { %2353 = vtanh.f32 %v2944_v32 }
 0xd09   :  { %2355 = vtanh.f32 %v2946_v39 }
 0xd0a   :  { %v970_v35 = vpop.permute.xlu1 %969 }
 0xd0b   :  { %v2951_v37 = vadd.f32 %v970_v35, %v962_v24 }
 0xd0d   :  { %2357 = vtanh.f32 %v2951_v37 }
 0xd12   :  { %v2354_v11 = vpop.eup %2353 }
 0xd13   :  { %v2356_v38 = vpop.eup %2355  ;;  %951 = vrot.lane.b32.xlu1 %v2354_v11, %s2527_s4 }
 0xd14   :  { %927 = vrot.lane.b32.xlu0 %v2356_v38, %s2527_s4 }
 0xd17   :  { %v2358_v14 = vpop.eup %2357 }
 0xd18   :  { %975 = vrot.lane.b32.xlu0 %v2358_v14, %s2527_s4 }
 0xd85   :  { %v952_v40 = vpop.permute.xlu1 %951 }
 0xd86   :  { %v954_v48 = vmul.f32 %v2348_v55, %v952_v40  ;;  %v928_v2 = vpop.permute.xlu0 %927 }
 0xd87   :  { %v930_v3 = vmul.f32 %v2350_v6, %v928_v2 }
 0xd88   :  { %984 = vrot.lane.b32.xlu0 %v954_v48, %s2531_s0 }
 0xd89   :  { %980 = vrot.lane.b32.xlu1 %v930_v3, %s2528_s22 }
 0xd8a   :  { %v976_v21 = vpop.permute.xlu0 %975 }
 0xd8b   :  { %v978_v5 = vmul.f32 %v2352_v20, %v976_v21 }
 0xdfa   :  { %v985_v4 = vpop.permute.xlu0 %984 }
 0xdfb   :  { %v981_v7 = vpop.permute.xlu1 %980 }
 0xdfc   :  { %v987_v8 = vsel %vm337_vm1, %v981_v7, %v985_v4 }
 0xdfd   :  { %v988_v13 = vsel %vm339_vm2, %v987_v8, %v978_v5 }
 0xdfe   :  { %v989_v16 = vpack.c.bf16 %v988_v13, %v988_v13 }
 0xe00   :  { %1944 = vmatmul.mubr.msk.bf16.vlgmr.msra.gmra.mrb[16].mxu1 %vm263_vm3, %v989_v16  ;;  %2122 = vmatmul.mubr.msk.bf16.vlgmr.msra.gmra.mrb[24].mxu0 %vm263_vm3, %v989_v16 }
 0xe01   :  { %1163 = vmatpush1.bf16.msra.mxu1 %v2963_v17  ;;  %2126 = vmatpush3.bf16.msra.mxu0 %v2748_v51 }
 0xe02   :  { %1164 = vmatprep.subr.bf16.mxu1 %v2967_v18  ;;  %2127 = vmatprep.subr.bf16.mxu0 %v2529_v52 }
 0xe03   :  { %1194 = vmatprep.mubr.bf16.mxu1 %v2525_v0  ;;  %2137 = vmatprep.mubr.msk.bf16.mxu0 %vm2530_vm4, %v2529_v52 }
 0xe05   :  { %1165 = vmatpush1.bf16.msra.mxu1 %v2974_v19  ;;  %2128 = vmatpush3.bf16.msra.mxu0 %v2752_v53 }
 0xe06   :  { %1166 = vmatprep.subr.bf16.mxu1 %v2978_v50  ;;  %2129 = vmatprep.subr.bf16.mxu0 %v2529_v52 }
 0xe09   :  { %1167 = vmatpush1.bf16.msra.mxu1 %v2982_v1  ;;  %2130 = vmatpush3.bf16.msra.mxu0 %v2756_v47 }
 0xe0a   :  { %1168 = vmatprep.subr.bf16.mxu1 %v2986_v41  ;;  %2131 = vmatprep.subr.bf16.mxu0 %v2529_v52 }
 0xe0d   :  { %1169 = vmatpush1.bf16.msra.mxu1 %v2990_v26  ;;  %2132 = vmatpush3.bf16.msra.mxu0 %v2761_v56 }
 0xe0e   :  { %1170 = vmatprep.subr.bf16.mxu1 %v2994_v58  ;;  %2133 = vmatprep.subr.bf16.mxu0 %v2529_v52 }
 0xe11   :  { %1171 = vmatpush1.bf16.msra.mxu1 %v2998_v22  ;;  %2134 = vmatpush3.bf16.msra.mxu0 %v2766_v61 }
 0xe12   :  { %1172 = vmatprep.subr.bf16.mxu1 %v3002_v42  ;;  %2135 = vmatprep.subr.bf16.mxu0 %v2529_v52 }
 0xe15   :  { %1173 = vmatpush1.bf16.msra.mxu1 %v3006_v28  ;;  %2136 = vmatpush3.bf16.msra.mxu0 %v2771_v62 }
 0xe16   :  { %1331 = vmatprep.subr.bf16.mxu1 %v3010_v43  ;;  %2141 = vmatprep.subr.bf16.mxu0 %v2529_v52 }
 0xed3   :  { %v1027_v44 = vpop.f32.mrb[16].mxu1  ;;  %v1068_v45 = vpop.f32.mrb[24].mxu0 }
 0xed4   :  { %v1028_v49 = vadd.f32 %v1027_v44, %v2693_v30  ;;  %v1029_v54 = vpop.f32.mrb[17].mxu1  ;;  %v2123_v55 = vpop.f32.mrb[25].mxu0  ;;  %v1069_v25 = vadd.f32 %v1068_v45, %v2815_v34 }
 0xed5   :  { %v1030_v63 = vadd.f32 %v1029_v54, %v2732_v10  ;;  %v1031_v6 = vpop.f32.mrb[18].mxu1  ;;  %v1071_v9 = vpop.f32.mrb[26].mxu0 }
 0xed6   :  { %v1075_v12 = vadd.f32 %v1028_v49, %v142_v46  ;;  %v1032_v15 = vpop.f32.mrb[19].mxu1  ;;  %v2124_v20 = vpop.f32.mrb[27].mxu0  ;;  %v1948_v31 = vmul.f32 -1.442695, %v1069_v25 }
 0xed7   :  { %2359 = vtanh.f32 %v1030_v63  ;;  %v1947_v60 = vmul.f32 -1.442695, %v1030_v63 }
 0xed8   :  { %2361 = vtanh.f32 %v1075_v12  ;;  %v1946_v27 = vmul.f32 -1.442695, %v1075_v12 }
 0xed9   :  { %2363 = vtanh.f32 %v1069_v25 }
 0xeda   :  { %2365 = vpow2.f32 %v1947_v60 }
 0xedb   :  { %2367 = vpow2.f32 %v1946_v27 }
 0xedc   :  { %2369 = vpow2.f32 %v1948_v31 }
 0xee1   :  { %v2360_v23 = vpop.eup %2359 }
 0xee2   :  { %v2362_v36 = vpop.eup %2361  ;;  %1109 = vrot.lane.b32.xlu0 %v2360_v23, %s2527_s4 }
 0xee3   :  { %1085 = vrot.lane.b32.xlu1 %v2362_v36, %s2527_s4  ;;  %v2364_v29 = vpop.eup %2363 }
 0xee4   :  { %v2366_v33 = vpop.eup %2365 }
 0xee5   :  { %v2368_v24 = vpop.eup %2367  ;;  %v1103_v35 = vadd.f32 1.0, %v2366_v33 }
 0xee6   :  { %v1079_v11 = vadd.f32 1.0, %v2368_v24  ;;  %v2370_v38 = vpop.eup %2369 }
 0xee7   :  { %1133 = vrot.lane.b32.xlu1 %v2364_v29, %s2527_s4  ;;  %2371 = vrcp.f32 %v1103_v35  ;;  %v1127_v14 = vadd.f32 1.0, %v2370_v38 }
 0xee8   :  { %2373 = vrcp.f32 %v1079_v11 }
 0xee9   :  { %2375 = vrcp.f32 %v1127_v14 }
 0xef1   :  { %v2372_v40 = vpop.eup %2371 }
 0xef2   :  { %v2374_v2 = vpop.eup %2373  ;;  %v1107_v13 = vmul.f32 %v2372_v40, %v2944_v32 }
 0xef3   :  { %v2376_v5 = vpop.eup %2375  ;;  %v1083_v44 = vmul.f32 %v2374_v2, %v2946_v39 }
 0xef4   :  { %v1131_v54 = vmul.f32 %v2376_v5, %v2951_v37 }
 0xf54   :  { %v1110_v48 = vpop.permute.xlu0 %1109 }
 0xf55   :  { %v1112_v3 = vmul.f32 %v2372_v40, %v1110_v48  ;;  %v1086_v21 = vpop.permute.xlu1 %1085 }
 0xf56   :  { %v1088_v4 = vmul.f32 %v2374_v2, %v1086_v21 }
 0xf57   :  { %1114 = vrot.lane.b32.xlu1 %v1112_v3, %s2527_s4 }
 0xf58   :  { %1090 = vrot.lane.b32.xlu0 %v1088_v4, %s2527_s4 }
 0xf59   :  { %v1134_v7 = vpop.permute.xlu1 %1133 }
 0xf5a   :  { %v1136_v8 = vmul.f32 %v2376_v5, %v1134_v7 }
 0xf5c   :  { %1138 = vrot.lane.b32.xlu0 %v1136_v8, %s2527_s4 }
 0xfc9   :  { %v1115_v16 = vpop.permute.xlu1 %1114 }
 0xfca   :  { %v3027_v45 = vadd.f32 %v1115_v16, %v1107_v13  ;;  %v1091_v46 = vpop.permute.xlu0 %1090 }
 0xfcb   :  { %v3029_v49 = vadd.f32 %v1091_v46, %v1083_v44 }
 0xfcc   :  { %2377 = vtanh.f32 %v3027_v45 }
 0xfcd   :  { %2379 = vtanh.f32 %v3029_v49 }
 0xfce   :  { %v1139_v55 = vpop.permute.xlu0 %1138 }
 0xfcf   :  { %v3034_v63 = vadd.f32 %v1139_v55, %v1131_v54 }
 0xfd1   :  { %2381 = vtanh.f32 %v3034_v63 }
 0xfd6   :  { %v2378_v32 = vpop.eup %2377 }
 0xfd7   :  { %v2380_v6 = vpop.eup %2379  ;;  %1120 = vrot.lane.b32.xlu0 %v2378_v32, %s2527_s4 }
 0xfd8   :  { %1096 = vrot.lane.b32.xlu1 %v2380_v6, %s2527_s4 }
 0xfdb   :  { %v2382_v39 = vpop.eup %2381 }
 0xfdc   :  { %1144 = vrot.lane.b32.xlu1 %v2382_v39, %s2527_s4 }
0x1049   :  { %v1121_v9 = vpop.permute.xlu0 %1120 }
0x104a   :  { %v1123_v12 = vmul.f32 %v2372_v40, %v1121_v9  ;;  %v1097_v15 = vpop.permute.xlu1 %1096 }
0x104b   :  { %v1099_v20 = vmul.f32 %v2374_v2, %v1097_v15 }
0x104c   :  { %1153 = vrot.lane.b32.xlu1 %v1123_v12, %s2531_s0 }
0x104d   :  { %1149 = vrot.lane.b32.xlu0 %v1099_v20, %s2528_s22 }
0x104e   :  { %v1145_v37 = vpop.permute.xlu1 %1144 }
0x104f   :  { %v1147_v23 = vmul.f32 %v2376_v5, %v1145_v37 }
0x10be   :  { %v1154_v25 = vpop.permute.xlu1 %1153 }
0x10bf   :  { %v1150_v36 = vpop.permute.xlu0 %1149 }
0x10c0   :  { %v1156_v29 = vsel %vm337_vm1, %v1150_v36, %v1154_v25 }
0x10c1   :  { %v1157_v60 = vsel %vm339_vm2, %v1156_v29, %v1147_v23 }
0x10c2   :  { %v1158_v27 = vpack.c.bf16 %v1157_v60, %v1157_v60 }
0x10c4   :  { %1949 = vmatmul.mubr.msk.bf16.vlgmr.msra.gmra.mrb[20].mxu1 %vm263_vm3, %v1158_v27  ;;  %2138 = vmatmul.mubr.msk.bf16.vlgmr.msra.gmra.mrb[28].mxu0 %vm263_vm3, %v1158_v27 }
0x10c5   :  { %1332 = vmatpush1.bf16.msra.mxu1 %v2963_v17  ;;  %2142 = vmatpush3.bf16.msra.mxu0 %v2748_v51 }
0x10c6   :  { %1333 = vmatprep.subr.bf16.mxu1 %v2967_v18  ;;  %2143 = vmatprep.subr.bf16.mxu0 %v2529_v52 }
0x10c7   :  { %1363 = vmatprep.mubr.bf16.mxu1 %v2525_v0  ;;  %2153 = vmatprep.mubr.msk.bf16.mxu0 %vm2530_vm4, %v2529_v52 }
0x10c9   :  { %1334 = vmatpush1.bf16.msra.mxu1 %v2974_v19  ;;  %2144 = vmatpush3.bf16.msra.mxu0 %v2752_v53 }
0x10ca   :  { %1335 = vmatprep.subr.bf16.mxu1 %v2978_v50  ;;  %2145 = vmatprep.subr.bf16.mxu0 %v2529_v52 }
0x10cd   :  { %1336 = vmatpush1.bf16.msra.mxu1 %v2982_v1  ;;  %2146 = vmatpush3.bf16.msra.mxu0 %v2756_v47  ;;  %v3076_v47 = vld [vmem:[%s3278_s2] ss:$0 sm:$0xff] }
0x10ce   :  { %1337 = vmatprep.subr.bf16.mxu1 %v2986_v41  ;;  %2147 = vmatprep.subr.bf16.mxu0 %v2529_v52 }
0x10d1   :  { %1338 = vmatpush1.bf16.msra.mxu1 %v2990_v26  ;;  %2148 = vmatpush3.bf16.msra.mxu0 %v2761_v56  ;;  %v147_v56 = vadd.f32 %v3076_v47, %v2719_v57 }
0x10d2   :  { %1339 = vmatprep.subr.bf16.mxu1 %v2994_v58  ;;  %2149 = vmatprep.subr.bf16.mxu0 %v2529_v52 }
0x10d5   :  { %1340 = vmatpush1.bf16.msra.mxu1 %v2998_v22  ;;  %2150 = vmatpush3.bf16.msra.mxu0 %v2766_v61 }
0x10d6   :  { %1341 = vmatprep.subr.bf16.mxu1 %v3002_v42  ;;  %2151 = vmatprep.subr.bf16.mxu0 %v2529_v52 }
0x10d9   :  { %1342 = vmatpush1.bf16.msra.mxu1 %v3006_v28  ;;  %2152 = vmatpush3.bf16.msra.mxu0 %v2771_v62 }
0x10da   :  { %1500 = vmatprep.subr.bf16.mxu1 %v3010_v43  ;;  %2157 = vmatprep.subr.bf16.mxu0 %v2529_v52 }
0x1197   :  { %v1196_v51 = vpop.f32.mrb[20].mxu1  ;;  %v1237_v53 = vpop.f32.mrb[28].mxu0 }
0x1198   :  { %v1197_v61 = vadd.f32 %v1196_v51, %v2693_v30  ;;  %v1198_v31 = vpop.f32.mrb[21].mxu1  ;;  %v2139_v33 = vpop.f32.mrb[29].mxu0  ;;  %v1238_v14 = vadd.f32 %v1237_v53, %v2815_v34 }
0x1199   :  { %v1199_v62 = vadd.f32 %v1198_v31, %v2732_v10  ;;  %v1200_v24 = vpop.f32.mrb[22].mxu1  ;;  %v1240_v43 = vpop.f32.mrb[30].mxu0 }
0x119a   :  { %v1244_v35 = vadd.f32 %v1197_v61, %v147_v56  ;;  %v1201_v11 = vpop.f32.mrb[23].mxu1  ;;  %v2140_v38 = vpop.f32.mrb[31].mxu0  ;;  %v1953_v21 = vmul.f32 -1.442695, %v1238_v14 }
0x119b   :  { %2383 = vtanh.f32 %v1199_v62  ;;  %v1952_v2 = vmul.f32 -1.442695, %v1199_v62  ;;  %v3111_v38 = vld [vmem:[#allocation3 + $0x8] ss:$12 sps:$4 sm:$0xff]  }
0x119c   :  { %2385 = vtanh.f32 %v1244_v35  ;;  %v1951_v3 = vmul.f32 -1.442695, %v1244_v35 }
0x119d   :  { %2387 = vtanh.f32 %v1238_v14  ;;  %v3120_v14 = vld [vmem:[#allocation3 + $0x20] ss:$12 sps:$4 sm:$0xff]  }
0x119e   :  { %2389 = vpow2.f32 %v1952_v2 }
0x119f   :  { %2391 = vpow2.f32 %v1951_v3 }
0x11a0   :  { %2393 = vpow2.f32 %v1953_v21 }
0x11a5   :  { %v2384_v40 = vpop.eup %2383 }
0x11a6   :  { %v2386_v48 = vpop.eup %2385  ;;  %1278 = vrot.lane.b32.xlu1 %v2384_v40, %s2527_s4 }
0x11a7   :  { %1254 = vrot.lane.b32.xlu0 %v2386_v48, %s2527_s4  ;;  %v2388_v57 = vpop.eup %2387 }
0x11a8   :  { %v2390_v4 = vpop.eup %2389 }
0x11a9   :  { %v2392_v5 = vpop.eup %2391  ;;  %v1272_v7 = vadd.f32 1.0, %v2390_v4 }
0x11aa   :  { %v1248_v8 = vadd.f32 1.0, %v2392_v5  ;;  %v2394_v13 = vpop.eup %2393 }
0x11ab   :  { %1302 = vrot.lane.b32.xlu0 %v2388_v57, %s2527_s4  ;;  %2395 = vrcp.f32 %v1272_v7  ;;  %v1296_v16 = vadd.f32 1.0, %v2394_v13 }
0x11ac   :  { %2397 = vrcp.f32 %v1248_v8 }
0x11ad   :  { %2399 = vrcp.f32 %v1296_v16 }
0x11b5   :  { %v2396_v44 = vpop.eup %2395 }
0x11b6   :  { %v2398_v54 = vpop.eup %2397  ;;  %v1276_v15 = vmul.f32 %v2396_v44, %v3027_v45 }
0x11b7   :  { %v2400_v39 = vpop.eup %2399  ;;  %v1252_v37 = vmul.f32 %v2398_v54, %v3029_v49 }
0x11b8   :  { %v1300_v29 = vmul.f32 %v2400_v39, %v3034_v63 }
0x1218   :  { %v1279_v46 = vpop.permute.xlu1 %1278 }
0x1219   :  { %v1281_v55 = vmul.f32 %v2396_v44, %v1279_v46  ;;  %v1255_v32 = vpop.permute.xlu0 %1254 }
0x121a   :  { %v1257_v6 = vmul.f32 %v2398_v54, %v1255_v32 }
0x121b   :  { %1283 = vrot.lane.b32.xlu0 %v1281_v55, %s2527_s4 }
0x121c   :  { %1259 = vrot.lane.b32.xlu1 %v1257_v6, %s2527_s4 }
0x121d   :  { %v1303_v9 = vpop.permute.xlu0 %1302 }
0x121e   :  { %v1305_v12 = vmul.f32 %v2400_v39, %v1303_v9 }
0x1220   :  { %1307 = vrot.lane.b32.xlu1 %v1305_v12, %s2527_s4 }
0x128d   :  { %v1284_v20 = vpop.permute.xlu0 %1283 }
0x128e   :  { %v3091_v25 = vadd.f32 %v1284_v20, %v1276_v15  ;;  %v1260_v23 = vpop.permute.xlu1 %1259 }
0x128f   :  { %v3093_v36 = vadd.f32 %v1260_v23, %v1252_v37 }
0x1290   :  { %2401 = vtanh.f32 %v3091_v25 }
0x1291   :  { %2403 = vtanh.f32 %v3093_v36 }
0x1292   :  { %v1308_v60 = vpop.permute.xlu1 %1307 }
0x1293   :  { %v3098_v27 = vadd.f32 %v1308_v60, %v1300_v29 }
0x1295   :  { %2405 = vtanh.f32 %v3098_v27 }
0x129a   :  { %v2402_v45 = vpop.eup %2401 }
0x129b   :  { %v2404_v51 = vpop.eup %2403  ;;  %1289 = vrot.lane.b32.xlu1 %v2402_v45, %s2527_s4 }
0x129c   :  { %1265 = vrot.lane.b32.xlu0 %v2404_v51, %s2527_s4 }
0x129f   :  { %v2406_v49 = vpop.eup %2405 }
0x12a0   :  { %1313 = vrot.lane.b32.xlu0 %v2406_v49, %s2527_s4 }
0x130d   :  { %v1290_v53 = vpop.permute.xlu1 %1289 }
0x130e   :  { %v1292_v56 = vmul.f32 %v2396_v44, %v1290_v53  ;;  %v1266_v61 = vpop.permute.xlu0 %1265 }
0x130f   :  { %v1268_v31 = vmul.f32 %v2398_v54, %v1266_v61 }
0x1310   :  { %1322 = vrot.lane.b32.xlu0 %v1292_v56, %s2531_s0 }
0x1311   :  { %1318 = vrot.lane.b32.xlu1 %v1268_v31, %s2528_s22 }
0x1312   :  { %v1314_v63 = vpop.permute.xlu0 %1313 }
0x1313   :  { %v1316_v62 = vmul.f32 %v2400_v39, %v1314_v63 }
0x1382   :  { %v1323_v33 = vpop.permute.xlu0 %1322 }
0x1383   :  { %v1319_v24 = vpop.permute.xlu1 %1318 }
0x1384   :  { %v1325_v43 = vsel %vm337_vm1, %v1319_v24, %v1323_v33 }
0x1385   :  { %v1326_v35 = vsel %vm339_vm2, %v1325_v43, %v1316_v62 }
0x1386   :  { %v1327_v11 = vpack.c.bf16 %v1326_v35, %v1326_v35 }
0x1388   :  { %1954 = vmatmul.mubr.msk.bf16.vlgmr.msra.gmra.mrb[24].mxu1 %vm263_vm3, %v1327_v11  ;;  %2154 = vmatmul.mubr.msk.bf16.vlgmr.msra.gmra.mrb[32].mxu0 %vm263_vm3, %v1327_v11 }
0x1389   :  { %1501 = vmatpush1.bf16.msra.mxu1 %v2963_v17  ;;  %2158 = vmatpush3.bf16.msra.mxu0 %v3111_v38  ;;  %v3126_v17 = vld [vmem:[#allocation3 + $0x38] ss:$12 sps:$4 sm:$0xff]  }
0x138a   :  { %1502 = vmatprep.subr.bf16.mxu1 %v2967_v18  ;;  %2159 = vmatprep.subr.bf16.mxu0 %v2529_v52  ;;  %v3138_v18 = vld [vmem:[#allocation3 + $0x68] ss:$12 sps:$4 sm:$0xff]  }
0x138b   :  { %1532 = vmatprep.mubr.bf16.mxu1 %v2525_v0  ;;  %2169 = vmatprep.mubr.msk.bf16.mxu0 %vm2530_vm4, %v2529_v52  ;;  %v3132_v0 = vld [vmem:[#allocation3 + $0x50] ss:$12 sps:$4 sm:$0xff]  }
0x138d   :  { %1503 = vmatpush1.bf16.msra.mxu1 %v2974_v19  ;;  %2160 = vmatpush3.bf16.msra.mxu0 %v3120_v14  ;;  %v3144_v19 = vld [vmem:[#allocation3 + $0x80] ss:$12 sps:$4 sm:$0xff]  }
0x138e   :  { %1504 = vmatprep.subr.bf16.mxu1 %v2978_v50  ;;  %2161 = vmatprep.subr.bf16.mxu0 %v2529_v52 }
0x1391   :  { %1505 = vmatpush1.bf16.msra.mxu1 %v2982_v1  ;;  %2162 = vmatpush3.bf16.msra.mxu0 %v3126_v17 }
0x1392   :  { %1506 = vmatprep.subr.bf16.mxu1 %v2986_v41  ;;  %2163 = vmatprep.subr.bf16.mxu0 %v2529_v52  ;;  %v150_v41 = vadd.f32 %v3076_v47, %v2723_v59 }
0x1395   :  { %1507 = vmatpush1.bf16.msra.mxu1 %v2990_v26  ;;  %2164 = vmatpush3.bf16.msra.mxu0 %v3132_v0 }
0x1396   :  { %1508 = vmatprep.subr.bf16.mxu1 %v2994_v58  ;;  %2165 = vmatprep.subr.bf16.mxu0 %v2529_v52 }
0x1399   :  { %1509 = vmatpush1.bf16.msra.mxu1 %v2998_v22  ;;  %2166 = vmatpush3.bf16.msra.mxu0 %v3138_v18 }
0x139a   :  { %1510 = vmatprep.subr.bf16.mxu1 %v3002_v42  ;;  %2167 = vmatprep.subr.bf16.mxu0 %v2529_v52 }
0x139d   :  { %1511 = vmatpush1.bf16.msra.mxu1 %v3006_v28  ;;  %2168 = vmatpush3.bf16.msra.mxu0 %v3144_v19 }
0x139e   :  { %2173 = vmatprep.subr.bf16.mxu1 %v2529_v52  ;;  %2197 = vmatprep.subr.bf16.mxu0 %v2529_v52 }
0x145b   :  { %v1365_v50 = vpop.f32.mrb[24].mxu1  ;;  %v1406_v1 = vpop.f32.mrb[32].mxu0 }
0x145c   :  { %v1366_v26 = vadd.f32 %v1365_v50, %v2693_v30  ;;  %v1367_v58 = vpop.f32.mrb[25].mxu1  ;;  %v2155_v22 = vpop.f32.mrb[33].mxu0  ;;  %v1407_v3 = vadd.f32 %v1406_v1, %v2815_v34 }
0x145d   :  { %v1368_v42 = vadd.f32 %v1367_v58, %v2732_v10  ;;  %v1369_v28 = vpop.f32.mrb[26].mxu1  ;;  %v1409_v40 = vpop.f32.mrb[34].mxu0 }
0x145e   :  { %v1413_v48 = vadd.f32 %v1366_v26, %v150_v41  ;;  %v1370_v57 = vpop.f32.mrb[27].mxu1  ;;  %v2156_v2 = vpop.f32.mrb[35].mxu0  ;;  %v1958_v5 = vmul.f32 -1.442695, %v1407_v3 }
0x145f   :  { %2407 = vtanh.f32 %v1368_v42  ;;  %v1957_v59 = vmul.f32 -1.442695, %v1368_v42 }
0x1460   :  { %2409 = vtanh.f32 %v1413_v48  ;;  %v1956_v47 = vmul.f32 -1.442695, %v1413_v48 }
0x1461   :  { %2411 = vtanh.f32 %v1407_v3 }
0x1462   :  { %2413 = vpow2.f32 %v1957_v59 }
0x1463   :  { %2415 = vpow2.f32 %v1956_v47 }
0x1464   :  { %2417 = vpow2.f32 %v1958_v5 }
0x1469   :  { %v2408_v21 = vpop.eup %2407 }
0x146a   :  { %v2410_v4 = vpop.eup %2409  ;;  %1447 = vrot.lane.b32.xlu0 %v2408_v21, %s2527_s4 }
0x146b   :  { %1423 = vrot.lane.b32.xlu1 %v2410_v4, %s2527_s4  ;;  %v2412_v30 = vpop.eup %2411 }
0x146c   :  { %v2414_v7 = vpop.eup %2413 }
0x146d   :  { %v2416_v8 = vpop.eup %2415  ;;  %v1441_v13 = vadd.f32 1.0, %v2414_v7 }
0x146e   :  { %v1417_v16 = vadd.f32 1.0, %v2416_v8  ;;  %v2418_v44 = vpop.eup %2417 }
0x146f   :  { %1471 = vrot.lane.b32.xlu1 %v2412_v30, %s2527_s4  ;;  %2419 = vrcp.f32 %v1441_v13  ;;  %v1465_v46 = vadd.f32 1.0, %v2418_v44 }
0x1470   :  { %2421 = vrcp.f32 %v1417_v16 }
0x1471   :  { %2423 = vrcp.f32 %v1465_v46 }
0x1479   :  { %v2420_v54 = vpop.eup %2419 }
0x147a   :  { %v2422_v32 = vpop.eup %2421  ;;  %v1445_v37 = vmul.f32 %v2420_v54, %v3091_v25 }
0x147b   :  { %v2424_v12 = vpop.eup %2423  ;;  %v1421_v29 = vmul.f32 %v2422_v32, %v3093_v36 }
0x147c   :  { %v1469_v49 = vmul.f32 %v2424_v12, %v3098_v27 }
0x14dc   :  { %v1448_v55 = vpop.permute.xlu0 %1447 }
0x14dd   :  { %v1450_v6 = vmul.f32 %v2420_v54, %v1448_v55  ;;  %v1424_v39 = vpop.permute.xlu1 %1423 }
0x14de   :  { %v1426_v9 = vmul.f32 %v2422_v32, %v1424_v39 }
0x14df   :  { %1452 = vrot.lane.b32.xlu1 %v1450_v6, %s2527_s4 }
0x14e0   :  { %1428 = vrot.lane.b32.xlu0 %v1426_v9, %s2527_s4 }
0x14e1   :  { %v1472_v15 = vpop.permute.xlu1 %1471 }
0x14e2   :  { %v1474_v20 = vmul.f32 %v2424_v12, %v1472_v15 }
0x14e4   :  { %1476 = vrot.lane.b32.xlu0 %v1474_v20, %s2527_s4 }
0x1551   :  { %v1453_v23 = vpop.permute.xlu1 %1452 }
0x1552   :  { %v3162_v60 = vadd.f32 %v1453_v23, %v1445_v37  ;;  %v1429_v45 = vpop.permute.xlu0 %1428 }
0x1553   :  { %v1431_v51 = vadd.f32 %v1429_v45, %v1421_v29 }
0x1554   :  { %2425 = vtanh.f32 %v3162_v60 }
0x1555   :  { %2427 = vtanh.f32 %v1431_v51 }
0x1556   :  { %v1477_v53 = vpop.permute.xlu0 %1476 }
0x1557   :  { %v3166_v56 = vadd.f32 %v1477_v53, %v1469_v49 }
0x1559   :  { %2429 = vtanh.f32 %v3166_v56 }
0x155e   :  { %v2426_v61 = vpop.eup %2425 }
0x155f   :  { %v2428_v31 = vpop.eup %2427  ;;  %1458 = vrot.lane.b32.xlu0 %v2426_v61, %s2527_s4 }
0x1560   :  { %1434 = vrot.lane.b32.xlu1 %v2428_v31, %s2527_s4 }
0x1563   :  { %v2430_v25 = vpop.eup %2429 }
0x1564   :  { %1482 = vrot.lane.b32.xlu1 %v2430_v25, %s2527_s4 }
0x15d1   :  { %v1459_v36 = vpop.permute.xlu0 %1458 }
0x15d2   :  { %v1461_v63 = vmul.f32 %v2420_v54, %v1459_v36  ;;  %v1435_v33 = vpop.permute.xlu1 %1434 }
0x15d3   :  { %v1437_v62 = vmul.f32 %v2422_v32, %v1435_v33 }
0x15d4   :  { %1491 = vrot.lane.b32.xlu1 %v1461_v63, %s2531_s0 }
0x15d5   :  { %1487 = vrot.lane.b32.xlu0 %v1437_v62, %s2528_s22  ;;  %v2253_v62 = vld [vmem:[%s3281_s5] sm:$0xff]  }
0x15d6   :  { %v1483_v27 = vpop.permute.xlu1 %1482 }
0x15d7   :  { %v1485_v43 = vmul.f32 %v2424_v12, %v1483_v27  ;;  %v2254_v27 = vld [vmem:[%s3281_s5 + $0x8] sm:$0xff]  }
0x1646   :  { %v1492_v24 = vpop.permute.xlu1 %1491 }
0x1647   :  { %v3174_v35 = vpop.permute.xlu0 %1487 }
0x1648   :  { %v1494_v11 = vsel %vm337_vm1, %v3174_v35, %v1492_v24 }
0x1649   :  { %v1495_v50 = vsel %vm339_vm2, %v1494_v11, %v1485_v43  ;;  %v2255_v43 = vld [vmem:[%s3283_s7] sm:$0xff]   ;;  %v2257_v11 = vld [vmem:[%s3283_s7 + $0x10] sm:$0xff]  }
0x164a   :  { %v1496_v1 = vpack.c.bf16 %v1495_v50, %v1495_v50 }
0x164c   :  { %1959 = vmatmul.mubr.msk.bf16.vlgmr.msra.gmra.mrb[28].mxu1 %vm263_vm3, %v1496_v1  ;;  %2170 = vmatmul.mubr.msk.bf16.vlgmr.msra.gmra.mrb[36].mxu0 %vm263_vm3, %v1496_v1 }
0x164d   :  { %2174 = vmatpush3.bf16.msra.mxu1 %v3111_v38  ;;  %2185 = vmatprep.mubr.msk.bf16.mxu1 %vm2530_vm4, %v2529_v52 }
0x164e   :  { %2175 = vmatprep.subr.bf16.mxu1 %v2529_v52  ;;  %2213 = vmatprep.mubr.msk.bf16.mxu0 %vm2530_vm4, %v2529_v52 }
0x164f   :  { %2198 = vmatpush3.bf16.msra.mxu0 %v2255_v43 }
0x1650   :  { %2199 = vmatprep.subr.bf16.mxu0 %v2529_v52 }
0x1651   :  { %2176 = vmatpush3.bf16.msra.mxu1 %v3120_v14 }
0x1652   :  { %2177 = vmatprep.subr.bf16.mxu1 %v2529_v52 }
0x1655   :  { %2178 = vmatpush3.bf16.msra.mxu1 %v3126_v17 }
0x1656   :  { %2179 = vmatprep.subr.bf16.mxu1 %v2529_v52 }
0x1659   :  { %2180 = vmatpush3.bf16.msra.mxu1 %v3132_v0 }
0x165a   :  { %2181 = vmatprep.subr.bf16.mxu1 %v2529_v52 }
0x165d   :  { %2182 = vmatpush3.bf16.msra.mxu1 %v3138_v18 }
0x165e   :  { %2183 = vmatprep.subr.bf16.mxu1 %v2529_v52 }
0x1661   :  { %2184 = vmatpush3.bf16.msra.mxu1 %v3144_v19 }
0x1662   :  { %2189 = vmatprep.subr.bf16.mxu1 %v2529_v52 }
0x171f   :  { %v1534_v38 = vpop.f32.mrb[28].mxu1  ;;  %v1574_v14 = vpop.f32.mrb[36].mxu0 }
0x1720   :  { %v1575_v41 = vadd.f32 %v1574_v14, %v2815_v34  ;;  %v1535_v26 = vpop.f32.mrb[29].mxu1  ;;  %v2171_v17 = vpop.f32.mrb[37].mxu0  ;;  %v2258_v38 = vld [vmem:[%s3283_s7 + $0x18] sm:$0xff]  }
0x1721   :  { %v1536_v58 = vadd.f32 %v1535_v26, %v2732_v10  ;;  %v1537_v22 = vpop.f32.mrb[30].mxu1  ;;  %v1577_v0 = vpop.f32.mrb[38].mxu0  ;;  %v2260_v26 = vld [vmem:[%s3283_s7 + $0x28] sm:$0xff]  }
0x1722   :  { %2431 = vtanh.f32 %v1575_v41  ;;  %v1538_v42 = vpop.f32.mrb[31].mxu1  ;;  %v2172_v28 = vpop.f32.mrb[39].mxu0  ;;  %v1962_v19 = vmul.f32 -1.442695, %v1575_v41  ;;  %v2259_v41 = vld [vmem:[%s3283_s7 + $0x20] sm:$0xff]   ;;  %v2262_v22 = vld [vmem:[%s3283_s7 + $0x38] sm:$0xff]  }
0x1723   :  { %2433 = vtanh.f32 %v1536_v58  ;;  %v1961_v48 = vmul.f32 -1.442695, %v1536_v58  ;;  %v2261_v58 = vld [vmem:[%s3283_s7 + $0x30] sm:$0xff]   ;;  %v1965_v0 = vld [vmem:[%s3282_s6] ss:$0 sm:$0xff] }
0x1724   :  { %2435 = vpow2.f32 %v1962_v19 }
0x1725   :  { %2437 = vpow2.f32 %v1961_v48 }
0x172c   :  { %v2432_v18 = vpop.eup %2431 }
0x172d   :  { %v2434_v40 = vpop.eup %2433  ;;  %1613 = vrot.lane.b32.xlu1 %v2432_v18, %s2527_s4 }
0x172e   :  { %1589 = vrot.lane.b32.xlu0 %v2434_v40, %s2527_s4  ;;  %v2436_v57 = vpop.eup %2435 }
0x172f   :  { %v2438_v2 = vpop.eup %2437  ;;  %v1607_v3 = vadd.f32 1.0, %v2436_v57 }
0x1730   :  { %v1583_v10 = vadd.f32 1.0, %v2438_v2 }
0x1731   :  { %2439 = vrcp.f32 %v1607_v3 }
0x1732   :  { %2441 = vrcp.f32 %v1583_v10 }
0x173b   :  { %v2440_v21 = vpop.eup %2439 }
0x173c   :  { %v2442_v30 = vpop.eup %2441  ;;  %v1611_v7 = vmul.f32 %v2440_v21, %v3166_v56 }
0x173d   :  { %v1587_v13 = vmul.f32 %v2442_v30, %v3162_v60 }
0x179f   :  { %v1614_v4 = vpop.permute.xlu1 %1613 }
0x17a0   :  { %v1616_v59 = vmul.f32 %v2440_v21, %v1614_v4  ;;  %v1590_v47 = vpop.permute.xlu0 %1589 }
0x17a1   :  { %v1592_v5 = vmul.f32 %v2442_v30, %v1590_v47 }
0x17a2   :  { %1618 = vrot.lane.b32.xlu1 %v1616_v59, %s2527_s4 }
0x17a3   :  { %1594 = vrot.lane.b32.xlu0 %v1592_v5, %s2527_s4 }
0x1814   :  { %v1619_v8 = vpop.permute.xlu1 %1618 }
0x1815   :  { %v1621_v16 = vadd.f32 %v1619_v8, %v1611_v7  ;;  %v1595_v44 = vpop.permute.xlu0 %1594 }
0x1816   :  { %v1597_v46 = vadd.f32 %v1595_v44, %v1587_v13 }
0x1817   :  { %2443 = vtanh.f32 %v1621_v16 }
0x1818   :  { %2445 = vtanh.f32 %v1597_v46 }
0x1821   :  { %v2444_v54 = vpop.eup %2443 }
0x1822   :  { %v2446_v55 = vpop.eup %2445  ;;  %1624 = vrot.lane.b32.xlu1 %v2444_v54, %s2527_s4 }
0x1823   :  { %1600 = vrot.lane.b32.xlu0 %v2446_v55, %s2527_s4 }
0x1894   :  { %v1625_v39 = vpop.permute.xlu1 %1624 }
0x1895   :  { %v1601_v32 = vpop.permute.xlu0 %1600  ;;  %v1627_v9 = vmul.f32 %v2440_v21, %v1625_v39 }
0x1896   :  { %v1603_v6 = vmul.f32 %v2442_v30, %v1601_v32 }
0x1898   :  { %1629 = vrot.lane.b32.xlu0 %v1603_v6, %s2531_s0  ;;  %s2532_s0 = smov [#allocation6]  }
0x1899   :  { %s1892_s3 = sshll.u32 %s2532_s0, 4  ;;  %s1893_s3 = int_to_ptr.vmem [resolvable:$true] %s1892_s3 }
0x189a   :  { %s2496_s6 = scalar_lea.vmem %s1893_s3, 128  ;;  %p2501_p9 = scmp.lt.s32.totalorder %s1893_s3, %s1893_s3 }
0x189b   :  { %p2497_p8 = scmp.ne.s32.totalorder %s1893_s3, %s2496_s6  ;;  %p2502_p10 = scmp.lt.s32.totalorder %s2496_s6, %s2496_s6 }
0x189d   :  { %p2503_p11 = por %p2502_p10, %p2501_p9 }
0x189f   :  { %p2504_p12 = pnand %p2503_p11, %p2497_p8 }
0x190a   :  { %v1630_v12 = vpop.permute.xlu0 %1629 }
0x190b   :  { %v1632_v15 = vsel %vm337_vm1, %v3174_v35, %v1630_v12  ;;  %v2256_v35 = vld [vmem:[%s3283_s7 + $0x8] sm:$0xff]  }
0x190c   :  { %v1633_v20 = vsel %vm339_vm2, %v1632_v15, %v1627_v9  ;;  %2200 = vmatpush3.bf16.msra.mxu0 %v2256_v35 }
0x190d   :  { %v1634_v37 = vpack.c.bf16 %v1633_v20, %v1633_v20  ;;  %2201 = vmatprep.subr.bf16.mxu0 %v2529_v52 }
0x190f   :  { %2186 = vmatmul.mubr.msk.bf16.vlgmr.msra.gmra.mrb[32].mxu1 %vm263_vm3, %v1634_v37 }
0x1910   :  { %2193 = vmatprep.mubr.msk.bf16.mxu1 %vm2530_vm4, %v2529_v52  ;;  %2190 = vmatpush3.bf16.msra.mxu1 %v2253_v62 }
0x1911   :  { %2191 = vmatprep.subr.bf16.mxu1 %v2529_v52  ;;  %2202 = vmatpush3.bf16.msra.mxu0 %v2257_v11 }
0x1912   :  { %2203 = vmatprep.subr.bf16.mxu0 %v2529_v52 }
0x1914   :  { %2192 = vmatpush3.bf16.msra.mxu1 %v2254_v27 }
0x1915   :  { %2204 = vmatpush3.bf16.msra.mxu0 %v2258_v38 }
0x1916   :  { %2205 = vmatprep.subr.bf16.mxu0 %v2529_v52 }
0x1919   :  { %2206 = vmatpush3.bf16.msra.mxu0 %v2259_v41 }
0x191a   :  { %2207 = vmatprep.subr.bf16.mxu0 %v2529_v52 }
0x191d   :  { %2208 = vmatpush3.bf16.msra.mxu0 %v2260_v26 }
0x191e   :  { %2209 = vmatprep.subr.bf16.mxu0 %v2529_v52 }
0x1921   :  { %2210 = vmatpush3.bf16.msra.mxu0 %v2261_v58 }
0x1922   :  { %2211 = vmatprep.subr.bf16.mxu0 %v2529_v52  ;;  %v1969_v52 = vld [vmem:[%s3284_s8] ss:$0 sm:$0xff] }
0x1925   :  { %2212 = vmatpush3.bf16.msra.mxu0 %v2262_v22 }
0x19e2   :  { %v1672_v23 = vpop.f32.mrb[32].mxu1 }
0x19e3   :  { %v1673_v29 = vadd.f32 %v1672_v23, %v2815_v34  ;;  %v2187_v60 = vpop.f32.mrb[33].mxu1 }
0x19e4   :  { %v1675_v45 = vpop.f32.mrb[34].mxu1 }
0x19e5   :  { %2447 = vtanh.f32 %v1673_v29  ;;  %v2188_v51 = vpop.f32.mrb[35].mxu1  ;;  %v1964_v53 = vmul.f32 -1.442695, %v1673_v29 }
0x19e7   :  { %2449 = vpow2.f32 %v1964_v53 }
0x19ef   :  { %v2448_v49 = vpop.eup %2447 }
0x19f0   :  { %1687 = vrot.lane.b32.xlu1 %v2448_v49, %s2527_s4 }
0x19f1   :  { %v2450_v56 = vpop.eup %2449 }
0x19f2   :  { %v1681_v61 = vadd.f32 1.0, %v2450_v56 }
0x19f4   :  { %2451 = vrcp.f32 %v1681_v61 }
0x19fe   :  { %v2452_v31 = vpop.eup %2451 }
0x19ff   :  { %v1685_v63 = vmul.f32 %v2452_v31, %v1621_v16 }
0x1a62   :  { %v1688_v25 = vpop.permute.xlu1 %1687 }
0x1a63   :  { %v1690_v36 = vmul.f32 %v2452_v31, %v1688_v25 }
0x1a65   :  { %1692 = vrot.lane.b32.xlu0 %v1690_v36, %s2527_s4 }
0x1ad7   :  { %v1693_v33 = vpop.permute.xlu0 %1692 }
0x1ad8   :  { %v1695_v34 = vadd.f32 %v1693_v33, %v1685_v63 }
0x1ada   :  { %2453 = vtanh.f32 %v1695_v34 }
0x1ae4   :  { %v2454_v24 = vpop.eup %2453 }
0x1ae5   :  { %1698 = vrot.lane.b32.xlu1 %v2454_v24, %s2527_s4 }
0x1b57   :  { %v1699_v50 = vpop.permute.xlu1 %1698 }
0x1b58   :  { %v1701_v1 = vmul.f32 %v2452_v31, %v1699_v50 }
0x1b5a   :  { %v1702_v14 = vpack.c.bf16 %v1701_v1, %v1701_v1 }
0x1b5c   :  { %1715 = vrot.lane.b32.xlu0 %v1702_v14, %s2528_s22 }
0x1bce   :  { %v1716_v17 = vpop.permute.xlu0 %1715 }
0x1bcf   :  { %2194 = vmatmul.mubr.msk.bf16.vlgmr.msra.gmra.mrb[36].mxu1 %vm337_vm1, %v1716_v17 }
0x1ca2   :  { %v1766_v42 = vpop.f32.mrb[36].mxu1 }
0x1ca3   :  { %v1767_v28 = vadd.f32 %v1965_v0, %v1766_v42  ;;  %v2195_v18 = vpop.f32.mrb[37].mxu1 }
0x1ca4   :  { %v1769_v40 = vpop.f32.mrb[38].mxu1 }
0x1ca5   :  { %v1772_v19 = vmax.f32 %v1767_v28, 0.0  ;;  %v2196_v48 = vpop.f32.mrb[39].mxu1 }
0x1ca7   :  { %v1773_v57 = vpack.c.bf16 %v1772_v19, %v1772_v19 }
0x1ca9   :  { %2214 = vmatmul.mubr.bf16.vlgmr.msra.gmra.mrb[40].mxu0 %v1773_v57 }
0x1d7c   :  { %v1879_v2 = vpop.f32.mrb[40].mxu0 }
0x1d7d   :  { %v1880_v3 = vadd.f32 %v1969_v52, %v1879_v2  ;;  %v2215_v10 = vpop.f32.mrb[41].mxu0 }
0x1d7e   :  { %v1882_v21 = vpop.f32.mrb[42].mxu0 }
0x1d7f   :  { %1885 = vst [vmem:[#allocation6] sm:$0xff] %v1880_v3  ;;  %v2216_v4 = vpop.f32.mrb[43].mxu0 }
0x1d80   :  { %2507 = shalt.err (!%p2504_p12)
}
0x1d81   :  { %s2508_s8 = scalar_lea.hbm %s3285_s9, 128 }
0x1d82   :  { %p2509_p13 = scmp.ne.s32.totalorder %s3285_s9, %s2508_s8  ;;  %p2512_p0 = scmp.lt.u32.totalorder %s2508_s8, %s3285_s9 }
0x1d84   :  { %p2514_p1 = pnand %p2512_p0, %p2509_p13 }
0x1d86   :  { %2517 = shalt.err (!%p2514_p1)
}
0x1d87   :  { %1895 = dma.vmem_to_hbm [thread:$0]  %s1893_s3, 128, %s3285_s9, [#allocation5]  }
0x1d88   :  { %2520 = dma.done.wait [#allocation5], 128  }
0x1d89   :  { %2521 = vsyncadd [#allocation5], 4294967168 }
0x1d8a   :  { %1899 = vsyncpa [#allocation4], 1 }
0x1d8b   :  { %1900 = vsyncpa [#allocation5], 1 }

</bundles_post_ra>
